<compile_context>
chip_gen: v7x
topology: tpu7x:2x2x1
jax: 0.10.0
libtpu: 0.0.40
codegen_flags: <defaults>
</compile_context>

<pallas_src>
import functools

import jax
import jax.numpy as jnp
import numpy as np
from jax.experimental import pallas as pl
from jax.experimental.pallas import tpu as pltpu


# ----------------------------------------------------------------------------
# One-time parameter packing (NOT part of the per-call forward).
# ----------------------------------------------------------------------------
def prepare_params(lin_w, lin_b, w_param, rank, weights_dtype=jnp.bfloat16):
    """lin_w: [26R, C], lin_b: [26R], w_param: [1, R, 2, 2, H, W, 2]."""
    R = rank
    assert lin_w.shape[0] == 26 * R

    wv = jnp.asarray(lin_w[: 13 * R])       # value half  (torch: y[:, :13R])
    wg = jnp.asarray(lin_w[13 * R:])        # gate half   (torch: tanh(y[:, 13R:]))
    bv = jnp.asarray(lin_b[: 13 * R])
    bg = jnp.asarray(lin_b[13 * R:])

    # Fused Linear: one [C, 26R] weight, value columns first, gate columns last.
    w_cat_t = jnp.concatenate([wv.T, wg.T], axis=1).astype(jnp.float32)
    b_cat = jnp.concatenate([bv, bg]).reshape(1, 26 * R).astype(jnp.float32)

    # lerp/scale real-part shifts baked into a constant row vector:
    # within each rank's 12-block, col = type*4 + k*2 + comp
    #   type 0 (lerp),  comp 0 -> +0.5   (cols 0, 2)
    #   type 2 (scale), comp 0 -> +1.0   (cols 8, 10)
    shift = np.zeros((1, 12 * R), np.float32)
    for col in range(12 * R):
        t = col % 12
        if t in (0, 2):
            shift[0, col] = 0.5
        elif t in (8, 10):
            shift[0, col] = 1.0

    # learned tensor: [1,R,2,2,H,W,2] -> [R, 8, H, W]  (flat = pair*4 + k*2 + comp)
    w = w_param[0]                                  # [R, pair, k, H, W, comp]
    w = jnp.transpose(w, (0, 1, 2, 5, 3, 4))        # [R, pair, k, comp, H, W]
    R_, _, _, _, H, W = w.shape
    w_packed = w.reshape(R_, 8, H, W).astype(weights_dtype)

    return {
        "w_cat_t": w_cat_t,                         # [C, 26R]
        "b_cat": b_cat,                             # [1, 26R]
        "shift": jnp.asarray(shift),                # [1, 12R]
        "w_packed": w_packed,                       # [R, 8, H, W] (bf16 by default)
    }


# ----------------------------------------------------------------------------
# Kernel 1: fused context Linear (value|gate) + tanh gate + shift +
#           rank-weight L2-normalize + softmax.
# ----------------------------------------------------------------------------
def _ctx_kernel(x_ref, w_ref, b_ref, shift_ref, p_ref, wr_ref):
    x = x_ref[...].astype(jnp.float32)                 # (B, C)
    w = w_ref[...].astype(jnp.float32)                 # (C, 26R)
    B = x.shape[0]
    C = x.shape[1]
    N = w.shape[1]
    y = jnp.broadcast_to(b_ref[...].astype(jnp.float32), (B, N))
    if C <= 64:
        # Tiny contraction: exact f32 VPU accumulation (no MXU precision issue).
        for c in range(C):
            y = y + x[:, c:c + 1] * w[c:c + 1, :]
    else:
        y = y + jnp.dot(x, w, preferred_element_type=jnp.float32,
                        precision=jax.lax.Precision.HIGHEST)

    n13 = N // 2
    gated = y[:, :n13] * jnp.tanh(y[:, n13:])           # (B, 13R)

    n_mod = shift_ref.shape[1]                          # 12R
    p_ref[...] = gated[:, :n_mod] + shift_ref[...]      # shifted per-(b,r) params

    wrr = gated[:, n_mod:]                              # (B, R) raw rank weights
    norm = jnp.sqrt(jnp.sum(wrr * wrr, axis=-1, keepdims=True))
    wrr = wrr / jnp.maximum(norm, 1e-12)                # torch F.normalize(p=2)
    wrr = wrr - jnp.max(wrr, axis=-1, keepdims=True)
    e = jnp.exp(wrr)
    wr_ref[...] = e / jnp.sum(e, axis=-1, keepdims=True)


def ctx_transform(x, p):
    B = x.shape[0]
    n26 = p["w_cat_t"].shape[1]
    n13 = n26 // 2
    n_mod = p["shift"].shape[1]
    R = n13 - n_mod
    return pl.pallas_call(
        _ctx_kernel,
        out_shape=(jax.ShapeDtypeStruct((B, n_mod), jnp.float32),
                   jax.ShapeDtypeStruct((B, R), jnp.float32)),
    )(x, p["w_cat_t"], p["b_cat"], p["shift"])


# ----------------------------------------------------------------------------
# Kernel 2: per-rank complex lerp / addmul / projection, batched in-kernel,
#           rank-weighted accumulation into the resident output block
#           (or a VMEM scratch for non-f32 outputs).
# ----------------------------------------------------------------------------
def _weights_kernel(params_ref, wr_ref, w_ref, o_ref, *scratch,
                    eps, batch, row_chunk, n_row, lane_chunk, n_lane):
    acc_ref = scratch[0] if scratch else o_ref
    r = pl.program_id(2)
    n_rank = pl.num_programs(2)

    @pl.when(r == 0)
    def _():
        acc_ref[...] = jnp.zeros_like(acc_ref)

    base = 12 * r                      # column offset of this rank's params

    # ---- hoisted SMEM scalar reads: once per kernel invocation ------------
    coeffs = []
    for b in range(batch):
        per_k = []
        for k in (0, 1):
            cr = params_ref[b, base + 2 * k]          # lerp  (real, +0.5 baked)
            ci = params_ref[b, base + 2 * k + 1]      # lerp  (imag)
            br = params_ref[b, base + 4 + 2 * k]      # bias  (real)
            bi = params_ref[b, base + 5 + 2 * k]      # bias  (imag)
            sr = params_ref[b, base + 8 + 2 * k]      # scale (real, +1.0 baked)
            si = params_ref[b, base + 9 + 2 * k]      # scale (imag)
            per_k.append((cr, ci, br, bi, sr, si))
        coeffs.append((per_k, wr_ref[b, r]))

    def process(row, lane):
        rs = pl.ds(row, row_chunk)
        ls = pl.ds(lane, lane_chunk)
        # 8 weight components of this rank block (shared across batch);
        # cast to f32 so bf16 storage of the learned tensor works.
        z = [w_ref[c, rs, ls].astype(jnp.float32) for c in range(8)]
        # batch-independent lerp bases / differences, reused across b
        diffs = []
        for k in (0, 1):
            z1r, z1i = z[2 * k], z[2 * k + 1]
            z2r, z2i = z[4 + 2 * k], z[5 + 2 * k]
            diffs.append((z1r, z1i, z2r - z1r, z2i - z1i))

        for b in range(batch):
            per_k, wrb = coeffs[b]
            outs = []
            for k in (0, 1):
                z1r, z1i, dr, di = diffs[k]
                cr, ci, br, bi, sr, si = per_k[k]
                # complex lerp in z1 + c*dz form
                lr = z1r + cr * dr - ci * di
                li = z1i + cr * di + ci * dr
                # addmul: bias + lerped * scale (complex product)
                outs.append((br + (lr * sr - li * si),
                             bi + (lr * si + li * sr)))
            (o0r, o0i), (o1r, o1i) = outs
            inv = jax.lax.rsqrt(jnp.maximum(o1r * o1r + o1i * o1i, eps))
            val = (o0r * o1r + o0i * o1i) * inv           # (w0 . w1/|w1|)
            acc_ref[b, rs, ls] = acc_ref[b, rs, ls] + val * wrb

    total = n_row * n_lane
    if total == 1:
        process(0, 0)
    else:
        def body(idx, carry):
            ri = idx // n_lane
            li = idx % n_lane
            process(pl.multiple_of(ri * row_chunk, row_chunk),
                    pl.multiple_of(li * lane_chunk, lane_chunk))
            return carry
        jax.lax.fori_loop(0, total, body, 0,
                          unroll=(True if total <= 8 else 4))

    if scratch:
        @pl.when(r == n_rank - 1)
        def _():
            o_ref[...] = acc_ref[...].astype(o_ref.dtype)


# ----------------------------------------------------------------------------
# VMEM-aware tile selection.
# ----------------------------------------------------------------------------
def _vmem_capacity_bytes():
    try:
        return int(pltpu.get_tpu_info().vmem_capacity_bytes)
    except Exception:
        return 64 * 1024 * 1024      # v7x is the smallest generation


def _resident_bytes(th, tw, batch, w_bytes, out_bytes, use_acc):
    wt = 2 * 8 * th * tw * w_bytes          # double-buffered weight block
    ot = 2 * batch * th * tw * out_bytes    # double-buffered output block
    at = batch * th * tw * 4 if use_acc else 0
    return wt + ot + at


def _choose_spatial_tiles(H, W, batch, w_bytes, out_bytes, use_acc, budget):
    def lane_candidates():
        cands = [W]                          # prefer full W: contiguous DMA rows,
        if W % 128 == 0:                     # lane-dense output stores
            d = W // 2
            while d >= 128:
                if W % d == 0 and d % 128 == 0:
                    cands.append(d)
                d //= 2
        return cands

    def row_candidates():
        cands = [H]
        if H % 8 == 0:
            d = H // 2
            while d >= 8:
                if H % d == 0 and d % 8 == 0:
                    cands.append(d)
                d //= 2
        return cands

    lane_c = lane_candidates()
    row_c = row_candidates()
    th, tw = None, None
    for cw in lane_c:                        # largest tw first
        for ch in row_c:                     # largest th first
            if _resident_bytes(ch, cw, batch, w_bytes, out_bytes, use_acc) <= budget:
                th, tw = ch, cw
                break
        if th is not None:
            break
    if th is None:                           # nothing fits: smallest aligned tiles
        th, tw = row_c[-1], lane_c[-1]

    # Megacore: guarantee >= 2 spatial tiles when alignment allows, so both
    # v7x TensorCores get work on the "parallel" axes.
    if (H // th) * (W // tw) == 1:
        if H % 16 == 0:
            th = H // 2
        elif W % 256 == 0:
            tw = W // 2
    return th, tw


def weights_combine(params, wr, w_packed, out_dtype, eps):
    """params: [B, 12R] (SMEM), wr: [B, R] (SMEM), w_packed: [R, 8, H, W]."""
    B, R = wr.shape
    _, _, H, W = w_packed.shape
    w_bytes = jnp.dtype(w_packed.dtype).itemsize
    out_bytes = jnp.dtype(out_dtype).itemsize
    direct_acc = jnp.dtype(out_dtype) == jnp.dtype(jnp.float32)

    cap = _vmem_capacity_bytes()
    budget = max(6 * 1024 * 1024, (cap * 2) // 5)   # ~40% of physical VMEM
    th, tw = _choose_spatial_tiles(H, W, B, w_bytes, out_bytes,
                                   use_acc=not direct_acc, budget=budget)
    resident = _resident_bytes(th, tw, B, w_bytes, out_bytes, not direct_acc)
    vmem_limit = int(min(cap - cap // 8,
                         max(32 * 1024 * 1024, resident + (6 << 20))))

    grid = (H // th, W // tw, R)
    row_chunk = 8 if th % 8 == 0 else th
    n_row = th // row_chunk
    lane_chunk = 256 if (tw % 256 == 0 and tw > 256) else tw
    n_lane = tw // lane_chunk

    kernel = functools.partial(
        _weights_kernel, eps=float(eps), batch=B,
        row_chunk=row_chunk, n_row=n_row,
        lane_chunk=lane_chunk, n_lane=n_lane)

    scratch_shapes = [] if direct_acc else [pltpu.VMEM((B, th, tw), jnp.float32)]

    return pl.pallas_call(
        kernel,
        out_shape=jax.ShapeDtypeStruct((B, H, W), out_dtype),
        grid=grid,
        in_specs=[
            pl.BlockSpec(memory_space=pltpu.MemorySpace.SMEM),
            pl.BlockSpec(memory_space=pltpu.MemorySpace.SMEM),
            pl.BlockSpec((None, 8, th, tw), lambda hi, wi, r: (r, 0, hi, wi)),
        ],
        out_specs=pl.BlockSpec((B, th, tw), lambda hi, wi, r: (0, hi, wi)),
        scratch_shapes=scratch_shapes,
        compiler_params=pltpu.CompilerParams(
            dimension_semantics=("parallel", "parallel", "arbitrary"),
            vmem_limit_bytes=vmem_limit),
    )(params, wr, w_packed)


# ----------------------------------------------------------------------------
# Forward: two pallas_calls, no JAX glue in between.
# ----------------------------------------------------------------------------
def weights_lib_2d_gamma_forward(x, packed, *, eps=1e-12):
    params, wr = ctx_transform(x, packed)             # [B,12R], [B,R] (softmaxed)
    return weights_combine(params, wr, packed["w_packed"], x.dtype, eps)


# ----------------------------------------------------------------------------
# Pure-JAX reference (mirrors the torch module, all in float32)
# ----------------------------------------------------------------------------
def reference_forward(x, lin_w, lin_b, w_param, *, rank, eps=1e-12):
    B = x.shape[0]
    R = rank
    H, W = w_param.shape[4], w_param.shape[5]

    xt = jnp.dot(x, lin_w.T, precision=jax.lax.Precision.HIGHEST) + lin_b
    xt = xt[:, :13 * R] * jnp.tanh(xt[:, 13 * R:])

    mod = xt[:, :12 * R].reshape(B, R, 3, 2, 1, 1, 2)
    mod = jnp.broadcast_to(mod, (B, R, 3, 2, H, W, 2))
    shift_lerp = jnp.array([0.5, 0.0], jnp.float32).reshape(1, 1, 1, 2)
    shift_scale = jnp.array([1.0, 0.0], jnp.float32).reshape(1, 1, 1, 2)
    param_l = mod[:, :, 0] + shift_lerp
    param_b = mod[:, :, 1]
    param_s = mod[:, :, 2] + shift_scale

    def lerp(z1, z2, c):
        return jnp.stack(
            [(1 - c[..., 0]) * z1[..., 0] + c[..., 0] * z2[..., 0]
             - c[..., 1] * (z2[..., 1] - z1[..., 1]),
             (1 - c[..., 0]) * z1[..., 1] + c[..., 0] * z2[..., 1]
             + c[..., 1] * (z2[..., 0] - z1[..., 0])], axis=-1)

    def addmul(z1, z2, bias):
        return jnp.stack(
            [bias[..., 0] + (z1[..., 0] * z2[..., 0] - z1[..., 1] * z2[..., 1]),
             bias[..., 1] + (z1[..., 0] * z2[..., 1] + z1[..., 1] * z2[..., 0])],
            axis=-1)

    w = jnp.broadcast_to(w_param, (B, R, 2, 2, H, W, 2)).astype(jnp.float32)
    w = lerp(w[:, :, 0], w[:, :, 1], param_l)
    w = addmul(w, param_s, param_b)
    denom = jnp.sqrt(jnp.clip(jnp.sum(w[:, :, 1] ** 2, -1), eps, None))[..., None]
    theta = w[:, :, 1] / denom
    w = jnp.sum(w[:, :, 0] * theta, axis=-1)          # [B, R, H, W]

    wr = xt[:, 12 * R:]
    wr = wr / jnp.maximum(jnp.linalg.norm(wr, axis=-1, keepdims=True), 1e-12)
    wr = jax.nn.softmax(wr, axis=-1)
    return jnp.sum(w * wr[:, :, None, None], axis=1)


# ----------------------------------------------------------------------------
if __name__ == "__main__":
    # Small shapes consistent with the module:
    #   batch B=2, context_length C=8, rank R=4, output_shape=(H, W)=(8, 128)
    B, C, R, H, W = 2, 8, 4, 8, 128
    F = 26 * R
    eps = 1e-12

    key = jax.random.PRNGKey(0)
    k_x, k_w, k_b, k_p = jax.random.split(key, 4)

    x = jax.random.normal(k_x, (B, C), jnp.float32)
    lin_w = jax.random.normal(k_w, (F, C), jnp.float32) * 0.1       # Linear weight
    lin_b = jax.random.normal(k_b, (F,), jnp.float32) * 0.1         # Linear bias
    w_param = jax.random.normal(k_p, (1, R, 2, 2, H, W, 2), jnp.float32) * 0.001

    # The module default stores the learned tensor in bfloat16; do the same so
    # kernel 2's HBM stream is halved.  The reference sees the same bf16-rounded
    # values (apples-to-apples comparison, all arithmetic in f32 on both sides).
    w_param_store = w_param.astype(jnp.bfloat16)

    # One-time packing (parameter-creation time, NOT per forward call).
    packed = jax.tree_util.tree_map(
        jax.block_until_ready,
        prepare_params(lin_w, lin_b, w_param_store, rank=R,
                       weights_dtype=jnp.bfloat16))

    fwd = jax.jit(weights_lib_2d_gamma_forward, static_argnames=("eps",))
    out = jax.block_until_ready(fwd(x, packed))

    ref = jax.block_until_ready(
        reference_forward(x, lin_w, lin_b,
                          w_param_store.astype(jnp.float32), rank=R, eps=eps))

    assert out.shape == (B, H, W), out.shape
    np.testing.assert_allclose(np.asarray(out), np.asarray(ref),
                               rtol=1e-3, atol=1e-5)
    # TODO(synk): entropy_regularization=True branch (data-dependent entropy
    # bonus on the rank weights) is not implemented; module default is False.
    print("KERNEL_OK")
</pallas_src>

<mosaic_0001>
module attributes {stable_mosaic.version = 11 : i64} {
  func.func @_ctx_kernel(%arg0: memref<2x8xf32, #tpu.memory_space<vmem>>, %arg1: memref<8x104xf32, #tpu.memory_space<vmem>>, %arg2: memref<1x104xf32, #tpu.memory_space<vmem>>, %arg3: memref<1x48xf32, #tpu.memory_space<vmem>>, %arg4: memref<2x48xf32, #tpu.memory_space<vmem>>, %arg5: memref<2x4xf32, #tpu.memory_space<vmem>>) attributes {dimension_semantics = [], scalar_prefetch = 0 : i64, scratch_operands = 0 : i64, tpu.core_type = #tpu.core_type<tc>} {
    %c0 = arith.constant 0 : index
    %c0_0 = arith.constant 0 : index
    %0 = vector.load %arg0[%c0, %c0_0] : memref<2x8xf32, #tpu.memory_space<vmem>>, vector<2x8xf32>
    %c0_1 = arith.constant 0 : index
    %c0_2 = arith.constant 0 : index
    %1 = vector.load %arg1[%c0_1, %c0_2] : memref<8x104xf32, #tpu.memory_space<vmem>>, vector<8x104xf32>
    %c0_3 = arith.constant 0 : index
    %c0_4 = arith.constant 0 : index
    %2 = vector.load %arg2[%c0_3, %c0_4] : memref<1x104xf32, #tpu.memory_space<vmem>>, vector<1x104xf32>
    %3 = vector.shape_cast %2 : vector<1x104xf32> to vector<1x104xf32>
    %4 = vector.broadcast %3 : vector<1x104xf32> to vector<2x104xf32>
    %5 = vector.extract_strided_slice %0 {offsets = [0, 0], sizes = [2, 1], strides = [1, 1]} : vector<2x8xf32> to vector<2x1xf32>
    %6 = vector.extract_strided_slice %1 {offsets = [0, 0], sizes = [1, 104], strides = [1, 1]} : vector<8x104xf32> to vector<1x104xf32>
    %7 = vector.broadcast %5 : vector<2x1xf32> to vector<2x104xf32>
    %8 = vector.broadcast %6 : vector<1x104xf32> to vector<2x104xf32>
    %9 = arith.mulf %7, %8 : vector<2x104xf32>
    %10 = arith.addf %4, %9 : vector<2x104xf32>
    %11 = vector.extract_strided_slice %0 {offsets = [0, 1], sizes = [2, 1], strides = [1, 1]} : vector<2x8xf32> to vector<2x1xf32>
    %12 = vector.extract_strided_slice %1 {offsets = [1, 0], sizes = [1, 104], strides = [1, 1]} : vector<8x104xf32> to vector<1x104xf32>
    %13 = vector.broadcast %11 : vector<2x1xf32> to vector<2x104xf32>
    %14 = vector.broadcast %12 : vector<1x104xf32> to vector<2x104xf32>
    %15 = arith.mulf %13, %14 : vector<2x104xf32>
    %16 = arith.addf %10, %15 : vector<2x104xf32>
    %17 = vector.extract_strided_slice %0 {offsets = [0, 2], sizes = [2, 1], strides = [1, 1]} : vector<2x8xf32> to vector<2x1xf32>
    %18 = vector.extract_strided_slice %1 {offsets = [2, 0], sizes = [1, 104], strides = [1, 1]} : vector<8x104xf32> to vector<1x104xf32>
    %19 = vector.broadcast %17 : vector<2x1xf32> to vector<2x104xf32>
    %20 = vector.broadcast %18 : vector<1x104xf32> to vector<2x104xf32>
    %21 = arith.mulf %19, %20 : vector<2x104xf32>
    %22 = arith.addf %16, %21 : vector<2x104xf32>
    %23 = vector.extract_strided_slice %0 {offsets = [0, 3], sizes = [2, 1], strides = [1, 1]} : vector<2x8xf32> to vector<2x1xf32>
    %24 = vector.extract_strided_slice %1 {offsets = [3, 0], sizes = [1, 104], strides = [1, 1]} : vector<8x104xf32> to vector<1x104xf32>
    %25 = vector.broadcast %23 : vector<2x1xf32> to vector<2x104xf32>
    %26 = vector.broadcast %24 : vector<1x104xf32> to vector<2x104xf32>
    %27 = arith.mulf %25, %26 : vector<2x104xf32>
    %28 = arith.addf %22, %27 : vector<2x104xf32>
    %29 = vector.extract_strided_slice %0 {offsets = [0, 4], sizes = [2, 1], strides = [1, 1]} : vector<2x8xf32> to vector<2x1xf32>
    %30 = vector.extract_strided_slice %1 {offsets = [4, 0], sizes = [1, 104], strides = [1, 1]} : vector<8x104xf32> to vector<1x104xf32>
    %31 = vector.broadcast %29 : vector<2x1xf32> to vector<2x104xf32>
    %32 = vector.broadcast %30 : vector<1x104xf32> to vector<2x104xf32>
    %33 = arith.mulf %31, %32 : vector<2x104xf32>
    %34 = arith.addf %28, %33 : vector<2x104xf32>
    %35 = vector.extract_strided_slice %0 {offsets = [0, 5], sizes = [2, 1], strides = [1, 1]} : vector<2x8xf32> to vector<2x1xf32>
    %36 = vector.extract_strided_slice %1 {offsets = [5, 0], sizes = [1, 104], strides = [1, 1]} : vector<8x104xf32> to vector<1x104xf32>
    %37 = vector.broadcast %35 : vector<2x1xf32> to vector<2x104xf32>
    %38 = vector.broadcast %36 : vector<1x104xf32> to vector<2x104xf32>
    %39 = arith.mulf %37, %38 : vector<2x104xf32>
    %40 = arith.addf %34, %39 : vector<2x104xf32>
    %41 = vector.extract_strided_slice %0 {offsets = [0, 6], sizes = [2, 1], strides = [1, 1]} : vector<2x8xf32> to vector<2x1xf32>
    %42 = vector.extract_strided_slice %1 {offsets = [6, 0], sizes = [1, 104], strides = [1, 1]} : vector<8x104xf32> to vector<1x104xf32>
    %43 = vector.broadcast %41 : vector<2x1xf32> to vector<2x104xf32>
    %44 = vector.broadcast %42 : vector<1x104xf32> to vector<2x104xf32>
    %45 = arith.mulf %43, %44 : vector<2x104xf32>
    %46 = arith.addf %40, %45 : vector<2x104xf32>
    %47 = vector.extract_strided_slice %0 {offsets = [0, 7], sizes = [2, 1], strides = [1, 1]} : vector<2x8xf32> to vector<2x1xf32>
    %48 = vector.extract_strided_slice %1 {offsets = [7, 0], sizes = [1, 104], strides = [1, 1]} : vector<8x104xf32> to vector<1x104xf32>
    %49 = vector.broadcast %47 : vector<2x1xf32> to vector<2x104xf32>
    %50 = vector.broadcast %48 : vector<1x104xf32> to vector<2x104xf32>
    %51 = arith.mulf %49, %50 : vector<2x104xf32>
    %52 = arith.addf %46, %51 : vector<2x104xf32>
    %53 = vector.extract_strided_slice %52 {offsets = [0, 0], sizes = [2, 52], strides = [1, 1]} : vector<2x104xf32> to vector<2x52xf32>
    %54 = vector.extract_strided_slice %52 {offsets = [0, 52], sizes = [2, 52], strides = [1, 1]} : vector<2x104xf32> to vector<2x52xf32>
    %55 = math.tanh %54 : vector<2x52xf32>
    %56 = arith.mulf %53, %55 : vector<2x52xf32>
    %57 = vector.extract_strided_slice %56 {offsets = [0, 0], sizes = [2, 48], strides = [1, 1]} : vector<2x52xf32> to vector<2x48xf32>
    %c0_5 = arith.constant 0 : index
    %c0_6 = arith.constant 0 : index
    %58 = vector.load %arg3[%c0_5, %c0_6] : memref<1x48xf32, #tpu.memory_space<vmem>>, vector<1x48xf32>
    %59 = vector.broadcast %58 : vector<1x48xf32> to vector<2x48xf32>
    %60 = arith.addf %57, %59 : vector<2x48xf32>
    %c0_7 = arith.constant 0 : index
    %c0_8 = arith.constant 0 : index
    %61 = vector.load %arg4[%c0_7, %c0_8] : memref<2x48xf32, #tpu.memory_space<vmem>>, vector<2x48xf32>
    tpu.vector_store %arg4[%c0_7, %c0_8], %60 {strides = array<i32>} : memref<2x48xf32, #tpu.memory_space<vmem>>, vector<2x48xf32>,
    %62 = vector.extract_strided_slice %56 {offsets = [0, 48], sizes = [2, 4], strides = [1, 1]} : vector<2x52xf32> to vector<2x4xf32>
    %63 = arith.mulf %62, %62 : vector<2x4xf32>
    %cst = arith.constant dense<0.000000e+00> : vector<2xf32>
    %64 = vector.multi_reduction <add>, %63, %cst [1] : vector<2x4xf32> to vector<2xf32>
    %65 = vector.shape_cast %64 : vector<2xf32> to vector<2x1xf32>
    %66 = math.sqrt %65 : vector<2x1xf32>
    %cst_9 = arith.constant 9.99999996E-13 : f32
    %67 = vector.broadcast %cst_9 : f32 to vector<2x1xf32>
    %68 = arith.maximumf %66, %67 : vector<2x1xf32>
    %69 = vector.broadcast %68 : vector<2x1xf32> to vector<2x4xf32>
    %70 = arith.divf %62, %69 : vector<2x4xf32>
    %cst_10 = arith.constant dense<0xFF800000> : vector<2xf32>
    %71 = vector.multi_reduction <maximumf>, %70, %cst_10 [1] : vector<2x4xf32> to vector<2xf32>
    %72 = vector.shape_cast %71 : vector<2xf32> to vector<2x1xf32>
    %73 = vector.broadcast %72 : vector<2x1xf32> to vector<2x4xf32>
    %74 = arith.subf %70, %73 : vector<2x4xf32>
    %75 = math.exp %74 : vector<2x4xf32>
    %cst_11 = arith.constant dense<0.000000e+00> : vector<2xf32>
    %76 = vector.multi_reduction <add>, %75, %cst_11 [1] : vector<2x4xf32> to vector<2xf32>
    %77 = vector.shape_cast %76 : vector<2xf32> to vector<2x1xf32>
    %78 = vector.broadcast %77 : vector<2x1xf32> to vector<2x4xf32>
    %79 = arith.divf %75, %78 : vector<2x4xf32>
    %c0_12 = arith.constant 0 : index
    %c0_13 = arith.constant 0 : index
    %80 = vector.load %arg5[%c0_12, %c0_13] : memref<2x4xf32, #tpu.memory_space<vmem>>, vector<2x4xf32>
    tpu.vector_store %arg5[%c0_12, %c0_13], %79 {strides = array<i32>} : memref<2x4xf32, #tpu.memory_space<vmem>>, vector<2x4xf32>,
    return
  }
}

module attributes {stable_mosaic.version = 11 : i64} {
  func.func @_weights_kernel(%arg0: i32, %arg1: i32, %arg2: i32, %arg3: memref<2x48xf32, #tpu.memory_space<smem>>, %arg4: memref<2x4xf32, #tpu.memory_space<smem>>, %arg5: memref<1x8x8x128xbf16, #tpu.memory_space<vmem>>, %arg6: memref<2x8x128xf32, #tpu.memory_space<vmem>>) attributes {dimension_semantics = [#tpu.dimension_semantics<parallel>, #tpu.dimension_semantics<parallel>, #tpu.dimension_semantics<arbitrary>], iteration_bounds = array<i64: 1, 1, 4>, scalar_prefetch = 0 : i64, scratch_operands = 0 : i64, tpu.core_type = #tpu.core_type<tc>, window_params = [{transform_indices = @transform_0, window_bounds = array<i64: 2, 48>}, {transform_indices = @transform_1, window_bounds = array<i64: 2, 4>}, {transform_indices = @transform_2, window_bounds = array<i64: 1, 8, 8, 128>}, {transform_indices = @transform_3, window_bounds = array<i64: 2, 8, 128>}]} {
    %c0_i32 = arith.constant 0 : i32
    %0 = arith.cmpi eq, %arg2, %c0_i32 : i32
    %1 = arith.extui %0 : i1 to i32
    %c0_i32_0 = arith.constant 0 : i32
    %2 = arith.cmpi ne, %1, %c0_i32_0 : i32
    scf.if %2 {
      %cst_102 = arith.constant 0.000000e+00 : f32
      %268 = vector.broadcast %cst_102 : f32 to vector<2x8x128xf32>
      %c0_103 = arith.constant 0 : index
      %c0_104 = arith.constant 0 : index
      %c0_105 = arith.constant 0 : index
      %269 = vector.load %arg6[%c0_103, %c0_104, %c0_105] : memref<2x8x128xf32, #tpu.memory_space<vmem>>, vector<2x8x128xf32>
      tpu.vector_store %arg6[%c0_103, %c0_104, %c0_105], %268 {strides = array<i32>} : memref<2x8x128xf32, #tpu.memory_space<vmem>>, vector<2x8x128xf32>,
    } else {
    }
    %c12_i32 = arith.constant 12 : i32
    %3 = arith.muli %c12_i32, %arg2 : i32
    %c0_i32_1 = arith.constant 0 : i32
    %4 = arith.addi %3, %c0_i32_1 : i32
    %c0 = arith.constant 0 : index
    %5 = arith.index_cast %4 : i32 to index
    %6 = memref.load %arg3[%c0, %5] : memref<2x48xf32, #tpu.memory_space<smem>>
    %c0_i32_2 = arith.constant 0 : i32
    %7 = arith.addi %3, %c0_i32_2 : i32
    %c1_i32 = arith.constant 1 : i32
    %8 = arith.addi %7, %c1_i32 : i32
    %c0_3 = arith.constant 0 : index
    %9 = arith.index_cast %8 : i32 to index
    %10 = memref.load %arg3[%c0_3, %9] : memref<2x48xf32, #tpu.memory_space<smem>>
    %c4_i32 = arith.constant 4 : i32
    %11 = arith.addi %3, %c4_i32 : i32
    %c0_i32_4 = arith.constant 0 : i32
    %12 = arith.addi %11, %c0_i32_4 : i32
    %c0_5 = arith.constant 0 : index
    %13 = arith.index_cast %12 : i32 to index
    %14 = memref.load %arg3[%c0_5, %13] : memref<2x48xf32, #tpu.memory_space<smem>>
    %c5_i32 = arith.constant 5 : i32
    %15 = arith.addi %3, %c5_i32 : i32
    %c0_i32_6 = arith.constant 0 : i32
    %16 = arith.addi %15, %c0_i32_6 : i32
    %c0_7 = arith.constant 0 : index
    %17 = arith.index_cast %16 : i32 to index
    %18 = memref.load %arg3[%c0_7, %17] : memref<2x48xf32, #tpu.memory_space<smem>>
    %c8_i32 = arith.constant 8 : i32
    %19 = arith.addi %3, %c8_i32 : i32
    %c0_i32_8 = arith.constant 0 : i32
    %20 = arith.addi %19, %c0_i32_8 : i32
    %c0_9 = arith.constant 0 : index
    %21 = arith.index_cast %20 : i32 to index
    %22 = memref.load %arg3[%c0_9, %21] : memref<2x48xf32, #tpu.memory_space<smem>>
    %c9_i32 = arith.constant 9 : i32
    %23 = arith.addi %3, %c9_i32 : i32
    %c0_i32_10 = arith.constant 0 : i32
    %24 = arith.addi %23, %c0_i32_10 : i32
    %c0_11 = arith.constant 0 : index
    %25 = arith.index_cast %24 : i32 to index
    %26 = memref.load %arg3[%c0_11, %25] : memref<2x48xf32, #tpu.memory_space<smem>>
    %c2_i32 = arith.constant 2 : i32
    %27 = arith.addi %3, %c2_i32 : i32
    %c0_12 = arith.constant 0 : index
    %28 = arith.index_cast %27 : i32 to index
    %29 = memref.load %arg3[%c0_12, %28] : memref<2x48xf32, #tpu.memory_space<smem>>
    %c2_i32_13 = arith.constant 2 : i32
    %30 = arith.addi %3, %c2_i32_13 : i32
    %c1_i32_14 = arith.constant 1 : i32
    %31 = arith.addi %30, %c1_i32_14 : i32
    %c0_15 = arith.constant 0 : index
    %32 = arith.index_cast %31 : i32 to index
    %33 = memref.load %arg3[%c0_15, %32] : memref<2x48xf32, #tpu.memory_space<smem>>
    %c4_i32_16 = arith.constant 4 : i32
    %34 = arith.addi %3, %c4_i32_16 : i32
    %c2_i32_17 = arith.constant 2 : i32
    %35 = arith.addi %34, %c2_i32_17 : i32
    %c0_18 = arith.constant 0 : index
    %36 = arith.index_cast %35 : i32 to index
    %37 = memref.load %arg3[%c0_18, %36] : memref<2x48xf32, #tpu.memory_space<smem>>
    %c5_i32_19 = arith.constant 5 : i32
    %38 = arith.addi %3, %c5_i32_19 : i32
    %c2_i32_20 = arith.constant 2 : i32
    %39 = arith.addi %38, %c2_i32_20 : i32
    %c0_21 = arith.constant 0 : index
    %40 = arith.index_cast %39 : i32 to index
    %41 = memref.load %arg3[%c0_21, %40] : memref<2x48xf32, #tpu.memory_space<smem>>
    %c8_i32_22 = arith.constant 8 : i32
    %42 = arith.addi %3, %c8_i32_22 : i32
    %c2_i32_23 = arith.constant 2 : i32
    %43 = arith.addi %42, %c2_i32_23 : i32
    %c0_24 = arith.constant 0 : index
    %44 = arith.index_cast %43 : i32 to index
    %45 = memref.load %arg3[%c0_24, %44] : memref<2x48xf32, #tpu.memory_space<smem>>
    %c9_i32_25 = arith.constant 9 : i32
    %46 = arith.addi %3, %c9_i32_25 : i32
    %c2_i32_26 = arith.constant 2 : i32
    %47 = arith.addi %46, %c2_i32_26 : i32
    %c0_27 = arith.constant 0 : index
    %48 = arith.index_cast %47 : i32 to index
    %49 = memref.load %arg3[%c0_27, %48] : memref<2x48xf32, #tpu.memory_space<smem>>
    %c0_28 = arith.constant 0 : index
    %50 = arith.index_cast %arg2 : i32 to index
    %51 = memref.load %arg4[%c0_28, %50] : memref<2x4xf32, #tpu.memory_space<smem>>
    %c0_i32_29 = arith.constant 0 : i32
    %52 = arith.addi %3, %c0_i32_29 : i32
    %c1 = arith.constant 1 : index
    %53 = arith.index_cast %52 : i32 to index
    %54 = memref.load %arg3[%c1, %53] : memref<2x48xf32, #tpu.memory_space<smem>>
    %c0_i32_30 = arith.constant 0 : i32
    %55 = arith.addi %3, %c0_i32_30 : i32
    %c1_i32_31 = arith.constant 1 : i32
    %56 = arith.addi %55, %c1_i32_31 : i32
    %c1_32 = arith.constant 1 : index
    %57 = arith.index_cast %56 : i32 to index
    %58 = memref.load %arg3[%c1_32, %57] : memref<2x48xf32, #tpu.memory_space<smem>>
    %c4_i32_33 = arith.constant 4 : i32
    %59 = arith.addi %3, %c4_i32_33 : i32
    %c0_i32_34 = arith.constant 0 : i32
    %60 = arith.addi %59, %c0_i32_34 : i32
    %c1_35 = arith.constant 1 : index
    %61 = arith.index_cast %60 : i32 to index
    %62 = memref.load %arg3[%c1_35, %61] : memref<2x48xf32, #tpu.memory_space<smem>>
    %c5_i32_36 = arith.constant 5 : i32
    %63 = arith.addi %3, %c5_i32_36 : i32
    %c0_i32_37 = arith.constant 0 : i32
    %64 = arith.addi %63, %c0_i32_37 : i32
    %c1_38 = arith.constant 1 : index
    %65 = arith.index_cast %64 : i32 to index
    %66 = memref.load %arg3[%c1_38, %65] : memref<2x48xf32, #tpu.memory_space<smem>>
    %c8_i32_39 = arith.constant 8 : i32
    %67 = arith.addi %3, %c8_i32_39 : i32
    %c0_i32_40 = arith.constant 0 : i32
    %68 = arith.addi %67, %c0_i32_40 : i32
    %c1_41 = arith.constant 1 : index
    %69 = arith.index_cast %68 : i32 to index
    %70 = memref.load %arg3[%c1_41, %69] : memref<2x48xf32, #tpu.memory_space<smem>>
    %c9_i32_42 = arith.constant 9 : i32
    %71 = arith.addi %3, %c9_i32_42 : i32
    %c0_i32_43 = arith.constant 0 : i32
    %72 = arith.addi %71, %c0_i32_43 : i32
    %c1_44 = arith.constant 1 : index
    %73 = arith.index_cast %72 : i32 to index
    %74 = memref.load %arg3[%c1_44, %73] : memref<2x48xf32, #tpu.memory_space<smem>>
    %c2_i32_45 = arith.constant 2 : i32
    %75 = arith.addi %3, %c2_i32_45 : i32
    %c1_46 = arith.constant 1 : index
    %76 = arith.index_cast %75 : i32 to index
    %77 = memref.load %arg3[%c1_46, %76] : memref<2x48xf32, #tpu.memory_space<smem>>
    %c2_i32_47 = arith.constant 2 : i32
    %78 = arith.addi %3, %c2_i32_47 : i32
    %c1_i32_48 = arith.constant 1 : i32
    %79 = arith.addi %78, %c1_i32_48 : i32
    %c1_49 = arith.constant 1 : index
    %80 = arith.index_cast %79 : i32 to index
    %81 = memref.load %arg3[%c1_49, %80] : memref<2x48xf32, #tpu.memory_space<smem>>
    %c4_i32_50 = arith.constant 4 : i32
    %82 = arith.addi %3, %c4_i32_50 : i32
    %c2_i32_51 = arith.constant 2 : i32
    %83 = arith.addi %82, %c2_i32_51 : i32
    %c1_52 = arith.constant 1 : index
    %84 = arith.index_cast %83 : i32 to index
    %85 = memref.load %arg3[%c1_52, %84] : memref<2x48xf32, #tpu.memory_space<smem>>
    %c5_i32_53 = arith.constant 5 : i32
    %86 = arith.addi %3, %c5_i32_53 : i32
    %c2_i32_54 = arith.constant 2 : i32
    %87 = arith.addi %86, %c2_i32_54 : i32
    %c1_55 = arith.constant 1 : index
    %88 = arith.index_cast %87 : i32 to index
    %89 = memref.load %arg3[%c1_55, %88] : memref<2x48xf32, #tpu.memory_space<smem>>
    %c8_i32_56 = arith.constant 8 : i32
    %90 = arith.addi %3, %c8_i32_56 : i32
    %c2_i32_57 = arith.constant 2 : i32
    %91 = arith.addi %90, %c2_i32_57 : i32
    %c1_58 = arith.constant 1 : index
    %92 = arith.index_cast %91 : i32 to index
    %93 = memref.load %arg3[%c1_58, %92] : memref<2x48xf32, #tpu.memory_space<smem>>
    %c9_i32_59 = arith.constant 9 : i32
    %94 = arith.addi %3, %c9_i32_59 : i32
    %c2_i32_60 = arith.constant 2 : i32
    %95 = arith.addi %94, %c2_i32_60 : i32
    %c1_61 = arith.constant 1 : index
    %96 = arith.index_cast %95 : i32 to index
    %97 = memref.load %arg3[%c1_61, %96] : memref<2x48xf32, #tpu.memory_space<smem>>
    %c1_62 = arith.constant 1 : index
    %98 = arith.index_cast %arg2 : i32 to index
    %99 = memref.load %arg4[%c1_62, %98] : memref<2x4xf32, #tpu.memory_space<smem>>
    %c0_63 = arith.constant 0 : index
    %c0_64 = arith.constant 0 : index
    %c0_65 = arith.constant 0 : index
    %c0_66 = arith.constant 0 : index
    %100 = vector.load %arg5[%c0_63, %c0_64, %c0_65, %c0_66] : memref<1x8x8x128xbf16, #tpu.memory_space<vmem>>, vector<1x1x8x128xbf16>
    %101 = vector.shape_cast %100 : vector<1x1x8x128xbf16> to vector<8x128xbf16>
    %102 = arith.extf %101 : vector<8x128xbf16> to vector<8x128xf32>
    %c0_67 = arith.constant 0 : index
    %c1_68 = arith.constant 1 : index
    %c0_69 = arith.constant 0 : index
    %c0_70 = arith.constant 0 : index
    %103 = vector.load %arg5[%c0_67, %c1_68, %c0_69, %c0_70] : memref<1x8x8x128xbf16, #tpu.memory_space<vmem>>, vector<1x1x8x128xbf16>
    %104 = vector.shape_cast %103 : vector<1x1x8x128xbf16> to vector<8x128xbf16>
    %105 = arith.extf %104 : vector<8x128xbf16> to vector<8x128xf32>
    %c0_71 = arith.constant 0 : index
    %c2 = arith.constant 2 : index
    %c0_72 = arith.constant 0 : index
    %c0_73 = arith.constant 0 : index
    %106 = vector.load %arg5[%c0_71, %c2, %c0_72, %c0_73] : memref<1x8x8x128xbf16, #tpu.memory_space<vmem>>, vector<1x1x8x128xbf16>
    %107 = vector.shape_cast %106 : vector<1x1x8x128xbf16> to vector<8x128xbf16>
    %108 = arith.extf %107 : vector<8x128xbf16> to vector<8x128xf32>
    %c0_74 = arith.constant 0 : index
    %c3 = arith.constant 3 : index
    %c0_75 = arith.constant 0 : index
    %c0_76 = arith.constant 0 : index
    %109 = vector.load %arg5[%c0_74, %c3, %c0_75, %c0_76] : memref<1x8x8x128xbf16, #tpu.memory_space<vmem>>, vector<1x1x8x128xbf16>
    %110 = vector.shape_cast %109 : vector<1x1x8x128xbf16> to vector<8x128xbf16>
    %111 = arith.extf %110 : vector<8x128xbf16> to vector<8x128xf32>
    %c0_77 = arith.constant 0 : index
    %c4 = arith.constant 4 : index
    %c0_78 = arith.constant 0 : index
    %c0_79 = arith.constant 0 : index
    %112 = vector.load %arg5[%c0_77, %c4, %c0_78, %c0_79] : memref<1x8x8x128xbf16, #tpu.memory_space<vmem>>, vector<1x1x8x128xbf16>
    %113 = vector.shape_cast %112 : vector<1x1x8x128xbf16> to vector<8x128xbf16>
    %114 = arith.extf %113 : vector<8x128xbf16> to vector<8x128xf32>
    %c0_80 = arith.constant 0 : index
    %c5 = arith.constant 5 : index
    %c0_81 = arith.constant 0 : index
    %c0_82 = arith.constant 0 : index
    %115 = vector.load %arg5[%c0_80, %c5, %c0_81, %c0_82] : memref<1x8x8x128xbf16, #tpu.memory_space<vmem>>, vector<1x1x8x128xbf16>
    %116 = vector.shape_cast %115 : vector<1x1x8x128xbf16> to vector<8x128xbf16>
    %117 = arith.extf %116 : vector<8x128xbf16> to vector<8x128xf32>
    %c0_83 = arith.constant 0 : index
    %c6 = arith.constant 6 : index
    %c0_84 = arith.constant 0 : index
    %c0_85 = arith.constant 0 : index
    %118 = vector.load %arg5[%c0_83, %c6, %c0_84, %c0_85] : memref<1x8x8x128xbf16, #tpu.memory_space<vmem>>, vector<1x1x8x128xbf16>
    %119 = vector.shape_cast %118 : vector<1x1x8x128xbf16> to vector<8x128xbf16>
    %120 = arith.extf %119 : vector<8x128xbf16> to vector<8x128xf32>
    %c0_86 = arith.constant 0 : index
    %c7 = arith.constant 7 : index
    %c0_87 = arith.constant 0 : index
    %c0_88 = arith.constant 0 : index
    %121 = vector.load %arg5[%c0_86, %c7, %c0_87, %c0_88] : memref<1x8x8x128xbf16, #tpu.memory_space<vmem>>, vector<1x1x8x128xbf16>
    %122 = vector.shape_cast %121 : vector<1x1x8x128xbf16> to vector<8x128xbf16>
    %123 = arith.extf %122 : vector<8x128xbf16> to vector<8x128xf32>
    %124 = arith.subf %114, %102 : vector<8x128xf32>
    %125 = arith.subf %117, %105 : vector<8x128xf32>
    %126 = arith.subf %120, %108 : vector<8x128xf32>
    %127 = arith.subf %123, %111 : vector<8x128xf32>
    %128 = vector.broadcast %6 : f32 to vector<8x128xf32>
    %129 = arith.mulf %128, %124 : vector<8x128xf32>
    %130 = arith.addf %102, %129 : vector<8x128xf32>
    %131 = vector.broadcast %10 : f32 to vector<8x128xf32>
    %132 = arith.mulf %131, %125 : vector<8x128xf32>
    %133 = arith.subf %130, %132 : vector<8x128xf32>
    %134 = vector.broadcast %6 : f32 to vector<8x128xf32>
    %135 = arith.mulf %134, %125 : vector<8x128xf32>
    %136 = arith.addf %105, %135 : vector<8x128xf32>
    %137 = vector.broadcast %10 : f32 to vector<8x128xf32>
    %138 = arith.mulf %137, %124 : vector<8x128xf32>
    %139 = arith.addf %136, %138 : vector<8x128xf32>
    %140 = vector.broadcast %22 : f32 to vector<8x128xf32>
    %141 = arith.mulf %133, %140 : vector<8x128xf32>
    %142 = vector.broadcast %26 : f32 to vector<8x128xf32>
    %143 = arith.mulf %139, %142 : vector<8x128xf32>
    %144 = arith.subf %141, %143 : vector<8x128xf32>
    %145 = vector.broadcast %14 : f32 to vector<8x128xf32>
    %146 = arith.addf %145, %144 : vector<8x128xf32>
    %147 = vector.broadcast %26 : f32 to vector<8x128xf32>
    %148 = arith.mulf %133, %147 : vector<8x128xf32>
    %149 = vector.broadcast %22 : f32 to vector<8x128xf32>
    %150 = arith.mulf %139, %149 : vector<8x128xf32>
    %151 = arith.addf %148, %150 : vector<8x128xf32>
    %152 = vector.broadcast %18 : f32 to vector<8x128xf32>
    %153 = arith.addf %152, %151 : vector<8x128xf32>
    %154 = vector.broadcast %29 : f32 to vector<8x128xf32>
    %155 = arith.mulf %154, %126 : vector<8x128xf32>
    %156 = arith.addf %108, %155 : vector<8x128xf32>
    %157 = vector.broadcast %33 : f32 to vector<8x128xf32>
    %158 = arith.mulf %157, %127 : vector<8x128xf32>
    %159 = arith.subf %156, %158 : vector<8x128xf32>
    %160 = vector.broadcast %29 : f32 to vector<8x128xf32>
    %161 = arith.mulf %160, %127 : vector<8x128xf32>
    %162 = arith.addf %111, %161 : vector<8x128xf32>
    %163 = vector.broadcast %33 : f32 to vector<8x128xf32>
    %164 = arith.mulf %163, %126 : vector<8x128xf32>
    %165 = arith.addf %162, %164 : vector<8x128xf32>
    %166 = vector.broadcast %45 : f32 to vector<8x128xf32>
    %167 = arith.mulf %159, %166 : vector<8x128xf32>
    %168 = vector.broadcast %49 : f32 to vector<8x128xf32>
    %169 = arith.mulf %165, %168 : vector<8x128xf32>
    %170 = arith.subf %167, %169 : vector<8x128xf32>
    %171 = vector.broadcast %37 : f32 to vector<8x128xf32>
    %172 = arith.addf %171, %170 : vector<8x128xf32>
    %173 = vector.broadcast %49 : f32 to vector<8x128xf32>
    %174 = arith.mulf %159, %173 : vector<8x128xf32>
    %175 = vector.broadcast %45 : f32 to vector<8x128xf32>
    %176 = arith.mulf %165, %175 : vector<8x128xf32>
    %177 = arith.addf %174, %176 : vector<8x128xf32>
    %178 = vector.broadcast %41 : f32 to vector<8x128xf32>
    %179 = arith.addf %178, %177 : vector<8x128xf32>
    %180 = arith.mulf %172, %172 : vector<8x128xf32>
    %181 = arith.mulf %179, %179 : vector<8x128xf32>
    %182 = arith.addf %180, %181 : vector<8x128xf32>
    %cst = arith.constant 9.99999996E-13 : f32
    %183 = vector.broadcast %cst : f32 to vector<8x128xf32>
    %184 = arith.maximumf %182, %183 : vector<8x128xf32>
    %185 = math.rsqrt %184 : vector<8x128xf32>
    %186 = arith.mulf %146, %172 : vector<8x128xf32>
    %187 = arith.mulf %153, %179 : vector<8x128xf32>
    %188 = arith.addf %186, %187 : vector<8x128xf32>
    %189 = arith.mulf %188, %185 : vector<8x128xf32>
    %c0_89 = arith.constant 0 : index
    %c0_90 = arith.constant 0 : index
    %c0_91 = arith.constant 0 : index
    %190 = vector.load %arg6[%c0_89, %c0_90, %c0_91] : memref<2x8x128xf32, #tpu.memory_space<vmem>>, vector<1x8x128xf32>
    %191 = vector.shape_cast %190 : vector<1x8x128xf32> to vector<8x128xf32>
    %192 = vector.broadcast %51 : f32 to vector<8x128xf32>
    %193 = arith.mulf %189, %192 : vector<8x128xf32>
    %194 = arith.addf %191, %193 : vector<8x128xf32>
    %c0_92 = arith.constant 0 : index
    %c0_93 = arith.constant 0 : index
    %c0_94 = arith.constant 0 : index
    %195 = vector.load %arg6[%c0_92, %c0_93, %c0_94] : memref<2x8x128xf32, #tpu.memory_space<vmem>>, vector<1x8x128xf32>
    %196 = vector.shape_cast %195 : vector<1x8x128xf32> to vector<8x128xf32>
    %197 = vector.shape_cast %194 : vector<8x128xf32> to vector<1x8x128xf32>
    tpu.vector_store %arg6[%c0_92, %c0_93, %c0_94], %197 {strides = array<i32>} : memref<2x8x128xf32, #tpu.memory_space<vmem>>, vector<1x8x128xf32>,
    %198 = vector.broadcast %54 : f32 to vector<8x128xf32>
    %199 = arith.mulf %198, %124 : vector<8x128xf32>
    %200 = arith.addf %102, %199 : vector<8x128xf32>
    %201 = vector.broadcast %58 : f32 to vector<8x128xf32>
    %202 = arith.mulf %201, %125 : vector<8x128xf32>
    %203 = arith.subf %200, %202 : vector<8x128xf32>
    %204 = vector.broadcast %54 : f32 to vector<8x128xf32>
    %205 = arith.mulf %204, %125 : vector<8x128xf32>
    %206 = arith.addf %105, %205 : vector<8x128xf32>
    %207 = vector.broadcast %58 : f32 to vector<8x128xf32>
    %208 = arith.mulf %207, %124 : vector<8x128xf32>
    %209 = arith.addf %206, %208 : vector<8x128xf32>
    %210 = vector.broadcast %70 : f32 to vector<8x128xf32>
    %211 = arith.mulf %203, %210 : vector<8x128xf32>
    %212 = vector.broadcast %74 : f32 to vector<8x128xf32>
    %213 = arith.mulf %209, %212 : vector<8x128xf32>
    %214 = arith.subf %211, %213 : vector<8x128xf32>
    %215 = vector.broadcast %62 : f32 to vector<8x128xf32>
    %216 = arith.addf %215, %214 : vector<8x128xf32>
    %217 = vector.broadcast %74 : f32 to vector<8x128xf32>
    %218 = arith.mulf %203, %217 : vector<8x128xf32>
    %219 = vector.broadcast %70 : f32 to vector<8x128xf32>
    %220 = arith.mulf %209, %219 : vector<8x128xf32>
    %221 = arith.addf %218, %220 : vector<8x128xf32>
    %222 = vector.broadcast %66 : f32 to vector<8x128xf32>
    %223 = arith.addf %222, %221 : vector<8x128xf32>
    %224 = vector.broadcast %77 : f32 to vector<8x128xf32>
    %225 = arith.mulf %224, %126 : vector<8x128xf32>
    %226 = arith.addf %108, %225 : vector<8x128xf32>
    %227 = vector.broadcast %81 : f32 to vector<8x128xf32>
    %228 = arith.mulf %227, %127 : vector<8x128xf32>
    %229 = arith.subf %226, %228 : vector<8x128xf32>
    %230 = vector.broadcast %77 : f32 to vector<8x128xf32>
    %231 = arith.mulf %230, %127 : vector<8x128xf32>
    %232 = arith.addf %111, %231 : vector<8x128xf32>
    %233 = vector.broadcast %81 : f32 to vector<8x128xf32>
    %234 = arith.mulf %233, %126 : vector<8x128xf32>
    %235 = arith.addf %232, %234 : vector<8x128xf32>
    %236 = vector.broadcast %93 : f32 to vector<8x128xf32>
    %237 = arith.mulf %229, %236 : vector<8x128xf32>
    %238 = vector.broadcast %97 : f32 to vector<8x128xf32>
    %239 = arith.mulf %235, %238 : vector<8x128xf32>
    %240 = arith.subf %237, %239 : vector<8x128xf32>
    %241 = vector.broadcast %85 : f32 to vector<8x128xf32>
    %242 = arith.addf %241, %240 : vector<8x128xf32>
    %243 = vector.broadcast %97 : f32 to vector<8x128xf32>
    %244 = arith.mulf %229, %243 : vector<8x128xf32>
    %245 = vector.broadcast %93 : f32 to vector<8x128xf32>
    %246 = arith.mulf %235, %245 : vector<8x128xf32>
    %247 = arith.addf %244, %246 : vector<8x128xf32>
    %248 = vector.broadcast %89 : f32 to vector<8x128xf32>
    %249 = arith.addf %248, %247 : vector<8x128xf32>
    %250 = arith.mulf %242, %242 : vector<8x128xf32>
    %251 = arith.mulf %249, %249 : vector<8x128xf32>
    %252 = arith.addf %250, %251 : vector<8x128xf32>
    %cst_95 = arith.constant 9.99999996E-13 : f32
    %253 = vector.broadcast %cst_95 : f32 to vector<8x128xf32>
    %254 = arith.maximumf %252, %253 : vector<8x128xf32>
    %255 = math.rsqrt %254 : vector<8x128xf32>
    %256 = arith.mulf %216, %242 : vector<8x128xf32>
    %257 = arith.mulf %223, %249 : vector<8x128xf32>
    %258 = arith.addf %256, %257 : vector<8x128xf32>
    %259 = arith.mulf %258, %255 : vector<8x128xf32>
    %c1_96 = arith.constant 1 : index
    %c0_97 = arith.constant 0 : index
    %c0_98 = arith.constant 0 : index
    %260 = vector.load %arg6[%c1_96, %c0_97, %c0_98] : memref<2x8x128xf32, #tpu.memory_space<vmem>>, vector<1x8x128xf32>
    %261 = vector.shape_cast %260 : vector<1x8x128xf32> to vector<8x128xf32>
    %262 = vector.broadcast %99 : f32 to vector<8x128xf32>
    %263 = arith.mulf %259, %262 : vector<8x128xf32>
    %264 = arith.addf %261, %263 : vector<8x128xf32>
    %c1_99 = arith.constant 1 : index
    %c0_100 = arith.constant 0 : index
    %c0_101 = arith.constant 0 : index
    %265 = vector.load %arg6[%c1_99, %c0_100, %c0_101] : memref<2x8x128xf32, #tpu.memory_space<vmem>>, vector<1x8x128xf32>
    %266 = vector.shape_cast %265 : vector<1x8x128xf32> to vector<8x128xf32>
    %267 = vector.shape_cast %264 : vector<8x128xf32> to vector<1x8x128xf32>
    tpu.vector_store %arg6[%c1_99, %c0_100, %c0_101], %267 {strides = array<i32>} : memref<2x8x128xf32, #tpu.memory_space<vmem>>, vector<1x8x128xf32>,
    return
  }
  func.func @transform_0(%arg0: i32, %arg1: i32, %arg2: i32) -> (i32, i32) {
    %c0_i32 = arith.constant 0 : i32
    %c0_i32_0 = arith.constant 0 : i32
    %c0_i32_1 = arith.constant 0 : i32
    return %c0_i32, %c0_i32_0 : i32, i32
  }
  func.func @transform_1(%arg0: i32, %arg1: i32, %arg2: i32) -> (i32, i32) {
    %c0_i32 = arith.constant 0 : i32
    %c0_i32_0 = arith.constant 0 : i32
    %c0_i32_1 = arith.constant 0 : i32
    return %c0_i32, %c0_i32_0 : i32, i32
  }
  func.func @transform_2(%arg0: i32, %arg1: i32, %arg2: i32) -> (i32, i32, i32, i32) {
    %c0_i32 = arith.constant 0 : i32
    %c0_i32_0 = arith.constant 0 : i32
    return %arg2, %c0_i32, %arg0, %arg1 : i32, i32, i32, i32
  }
  func.func @transform_3(%arg0: i32, %arg1: i32, %arg2: i32) -> (i32, i32, i32) {
    %c0_i32 = arith.constant 0 : i32
    %c0_i32_0 = arith.constant 0 : i32
    return %c0_i32, %arg0, %arg1 : i32, i32, i32
  }
}

</mosaic_0001>

<bundles_post_ra>
// kernel: weights_lib_2d_gamma_forward.2
= control target key start
LH: loop header
LB: loop body
LE: loop exit
PB: predicated region body
PF: predicated region fallthrough
CT: control target
= control target key end

     0   :  { %11 = vsyncpa [#allocation3], 0  ;;  %s242_s18 = smov [#allocation2]   ;;  %s316_s0 = inlined_call_operand.hbm [shape: f32[2,8], index: 0, kind: input, shape index: {}]   ;;  %s317_s1 = inlined_call_operand.vmem [shape: f32[8,104], index: 1, kind: input, shape index: {}]   ;;  %s318_s2 = inlined_call_operand.vmem [shape: f32[1,104], index: 2, kind: input, shape index: {}]   ;;  %s319_s3 = inlined_call_operand.vmem [shape: f32[1,48], index: 3, kind: input, shape index: {}]   ;;  %s320_s4 = inlined_call_operand.vmem [shape: f32[2,48], index: 4, kind: output, shape index: {0}]   ;;  %s321_s5 = inlined_call_operand.vmem [shape: f32[2,4], index: 5, kind: output, shape index: {1}]  }
   0x1   :  { %s18_s19 = sshll.u32 %s242_s18, 4  ;;  %s218_s22 = scalar_lea.hbm %s316_s0, 32  ;;  %s19_s19 = int_to_ptr.vmem [resolvable:$true] %s18_s19 }
   0x2   :  { %p219_p0 = scmp.ne.s32.totalorder %s316_s0, %s218_s22  ;;  %p222_p1 = scmp.lt.u32.totalorder %s218_s22, %s316_s0 }
   0x4   :  { %p224_p2 = pnand %p222_p1, %p219_p0 }
   0x6   :  { %227 = shalt.err (!%p224_p2)
}
   0x7   :  { %s228_s27 = scalar_lea.vmem %s19_s19, 32  ;;  %p233_p4 = scmp.lt.s32.totalorder %s19_s19, %s19_s19 }
   0x8   :  { %p229_p3 = scmp.ne.s32.totalorder %s19_s19, %s228_s27  ;;  %p234_p5 = scmp.lt.s32.totalorder %s228_s27, %s228_s27 }
   0xa   :  { %p235_p6 = por %p234_p5, %p233_p4 }
   0xc   :  { %p236_p7 = pnand %p235_p6, %p229_p3 }
   0xe   :  { %239 = shalt.err (!%p236_p7)
}
   0xf   :  { %21 = dma.hbm_to_vmem [thread:$0]  %s316_s0, 32, %s19_s19, [#allocation3]  }
  0x10   :  { %240 = dma.done.wait [#allocation3], 32  }
  0x11   :  { %241 = vsyncadd [#allocation3], 4294967264  ;;  %v243_v0 = vmov 2   ;;  %v244_v1 = vmov 0   ;;  %v31_v2 = vld [vmem:[#allocation2] sm:$0x3]  ;;  %v45_v9 = vlaneseq }
  0x12   :  { %201 = vset.pattern.permute.xlu1 %v243_v0  ;;  %199 = vset.pattern.permute.xlu0 %v244_v1  ;;  %v245_v3 = vmov 3   ;;  %v246_v4 = vmov 1   ;;  %v247_v5 = vmov 4   ;;  %v248_v6 = vmov 5   ;;  %v32_v12 = vld [vmem:[%s317_s1] sm:$0xff]  ;;  %s251_s1 = smov 76  }
  0x13   :  { %62 = vperm.xlu1 %201, %v31_v2   ;;  %42 = vperm.xlu0 %199, %v31_v2   ;;  %v249_v7 = vmov 6   ;;  %v250_v8 = vmov 7   ;;  %v46_v10 = vshrl.u32 %v45_v9, 7  ;;  %v186_v18 = vld [vmem:[%s318_s2] ss:$0 sm:$0xff]  ;;  %vm135_vm0 = vcmask 386048  }
  0x14   :  { %v187_v54 = vld [vmem:[%s319_s3] ss:$0 sm:$0xff]  ;;  %s252_s11 = smov 80   ;;  %vm142_vm1 = vcmask 25600   ;;  %vm156_vm4 = vcmask 419200  }
  0x15   :  { %v47_v11 = vsub.s32 0, %v46_v10  ;;  %v57_v14 = vsub.s32 1, %v46_v10  ;;  %v67_v15 = vsub.s32 2, %v46_v10  ;;  %v77_v20 = vsub.s32 3, %v46_v10 }
  0x16   :  { %v87_v22 = vsub.s32 4, %v46_v10  ;;  %v97_v27 = vsub.s32 5, %v46_v10  ;;  %v107_v34 = vsub.s32 6, %v46_v10  ;;  %v117_v43 = vsub.s32 7, %v46_v10 }
  0x17   :  { %202 = vset.pattern.permute.xlu1 %v245_v3  ;;  %200 = vset.pattern.permute.xlu0 %v246_v4  ;;  %v48_v13 = vrot.slane %v32_v12, %v47_v11  ;;  %v58_v21 = vrot.slane %v32_v12, %v57_v14  ;;  %v68_v23 = vrot.slane %v32_v12, %v67_v15 }
  0x18   :  { %72 = vperm.xlu1 %202, %v31_v2   ;;  %52 = vperm.xlu0 %200, %v31_v2   ;;  %v78_v28 = vrot.slane %v32_v12, %v77_v20  ;;  %v88_v30 = vrot.slane %v32_v12, %v87_v22  ;;  %v98_v33 = vrot.slane %v32_v12, %v97_v27 }
  0x19   :  { %v108_v42 = vrot.slane %v32_v12, %v107_v34  ;;  %v118_v48 = vrot.slane %v32_v12, %v117_v43 }
  0x1c   :  { %203 = vset.pattern.permute.xlu1 %v247_v5  ;;  %204 = vset.pattern.permute.xlu0 %v248_v6 }
  0x1d   :  { %82 = vperm.xlu1 %203, %v31_v2   ;;  %92 = vperm.xlu0 %204, %v31_v2  }
  0x21   :  { %205 = vset.pattern.permute.xlu1 %v249_v7  ;;  %207 = vset.pattern.permute.xlu0 %v250_v8 }
  0x22   :  { %102 = vperm.xlu1 %205, %v31_v2  }
  0x26   :  { %206 = vset.pattern.permute.xlu1 %v250_v8 }
  0x27   :  { %112 = vperm.xlu1 %206, %v31_v2  }
  0x92   :  { %v63_v16 = vpop.permute.xlu1 %62  ;;  %v43_v17 = vpop.permute.xlu0 %42 }
  0x93   :  { %v49_v19 = vmul.f32 %v48_v13, %v43_v17  ;;  %v69_v31 = vmul.f32 %v68_v23, %v63_v16 }
  0x95   :  { %v50_v24 = vadd.f32 %v186_v18, %v49_v19 }
  0x97   :  { %v73_v25 = vpop.permute.xlu1 %72  ;;  %v53_v26 = vpop.permute.xlu0 %52 }
  0x98   :  { %v59_v29 = vmul.f32 %v58_v21, %v53_v26  ;;  %v79_v35 = vmul.f32 %v78_v28, %v73_v25 }
  0x9a   :  { %v60_v32 = vadd.f32 %v59_v29, %v50_v24 }
  0x9c   :  { %v70_v36 = vadd.f32 %v69_v31, %v60_v32  ;;  %v83_v37 = vpop.permute.xlu1 %82  ;;  %v93_v38 = vpop.permute.xlu0 %92 }
  0x9d   :  { %v89_v39 = vmul.f32 %v88_v30, %v83_v37  ;;  %v99_v41 = vmul.f32 %v98_v33, %v93_v38 }
  0x9e   :  { %v80_v40 = vadd.f32 %v79_v35, %v70_v36 }
  0xa0   :  { %v90_v44 = vadd.f32 %v89_v39, %v80_v40 }
  0xa1   :  { %v103_v45 = vpop.permute.xlu1 %102 }
  0xa2   :  { %v100_v46 = vadd.f32 %v99_v41, %v90_v44  ;;  %v109_v47 = vmul.f32 %v108_v42, %v103_v45 }
  0xa4   :  { %v110_v50 = vadd.f32 %v109_v47, %v100_v46 }
  0xa6   :  { %v113_v49 = vpop.permute.xlu1 %112 }
  0xa7   :  { %v119_v51 = vmul.f32 %v118_v48, %v113_v49 }
  0xa9   :  { %v120_v52 = vadd.f32 %v119_v51, %v110_v50 }
  0xab   :  { %208 = vtanh.f32 %v120_v52 }
  0xb5   :  { %v209_v53 = vpop.eup %208 }
  0xb6   :  { %123 = vrot.lane.b32.xlu0 %v209_v53, %s251_s1 }
 0x128   :  { %v124_v55 = vpop.permute.xlu0 %123 }
 0x129   :  { %v126_v56 = vmul.f32 %v124_v55, %v120_v52 }
 0x12b   :  { %v134_v57 = vadd.f32 %v187_v54, %v126_v56  ;;  %v137_v58 = vmul.f32 %v126_v56, %v126_v56 }
 0x12d   :  { %136 = vst.msk [vmem:[%s320_s4] sm:$0x3] %vm135_vm0, %v134_v57  ;;  %139 = vrot.lane.b32.xlu1 %v137_v58, %s252_s11 }
 0x19f   :  { %v140_v59 = vpop.permute.xlu1 %139 }
 0x1a0   :  { %v143_v60 = vsel %vm142_vm1, %v140_v59, 0.0 }
 0x1a1   :  { %144 = vadd.xlane.f32.xlu0 %v143_v60 }
 0x22e   :  { %v145_v61 = vpop.xlane.xlu0 %144 }
 0x22f   :  { %210 = vrsqrt.f32 %v145_v61  ;;  %vm148_vm2 = vcmp.eq.f32.partialorder %v145_v61, inf  ;;  %v151_v0 = vand.u32 2147483648, %v145_v61  ;;  %vm150_vm3 = vcmp.eq.f32.partialorder %v145_v61, 0.0 }
 0x239   :  { %v211_v62 = vpop.eup %210 }
 0x23a   :  { %v147_v63 = vmul.f32 %v211_v62, %v145_v61 }
 0x23c   :  { %v149_v1 = vsel %vm148_vm2, %v145_v61, %v147_v63 }
 0x23d   :  { %v152_v2 = vsel %vm150_vm3, %v151_v0, %v149_v1 }
 0x23e   :  { %v153_v3 = vmax.f32 %v152_v2, 1e-12 }
 0x240   :  { %212 = vrcp.f32 %v153_v3 }
 0x24a   :  { %v213_v4 = vpop.eup %212 }
 0x24b   :  { %v155_v5 = vmul.f32 %v213_v4, %v126_v56 }
 0x24d   :  { %v157_v6 = vsel %vm156_vm4, %v155_v5, -inf }
 0x24e   :  { %158 = vmax.xlane.f32.xlu1 %v157_v6 }
 0x2db   :  { %v159_v7 = vpop.xlane.xlu1 %158 }
 0x2dc   :  { %v160_v8 = vsub.f32 %v155_v5, %v159_v7 }
 0x2de   :  { %v161_v9 = vmul.f32 1.442695, %v160_v8 }
 0x2e0   :  { %214 = vpow2.f32 %v161_v9 }
 0x2ea   :  { %v215_v10 = vpop.eup %214 }
 0x2eb   :  { %164 = vrot.lane.b32.xlu0 %v215_v10, %s252_s11 }
 0x35d   :  { %v165_v11 = vpop.permute.xlu0 %164 }
 0x35e   :  { %v167_v12 = vsel %vm142_vm1, %v165_v11, 0.0 }
 0x35f   :  { %168 = vadd.xlane.f32.xlu1 %v167_v12 }
 0x3ec   :  { %v169_v13 = vpop.xlane.xlu1 %168 }
 0x3ed   :  { %216 = vrcp.f32 %v169_v13 }
 0x3f7   :  { %v217_v14 = vpop.eup %216 }
 0x3f8   :  { %v171_v15 = vmul.f32 %v217_v14, %v215_v10 }
 0x3fa   :  { %173 = vrot.lane.b32.xlu1 %v171_v15, %s252_s11 }
 0x46c   :  { %v174_v16 = vpop.permute.xlu1 %173 }
 0x46d   :  { %176 = vst.msk [vmem:[%s321_s5] sm:$0x3] %vm142_vm1, %v174_v16 }
 0x46e   :  { %185 = vsyncpa [#allocation3], 1 }

// kernel: weights_lib_2d_gamma_forward.3
= control target key start
LH: loop header
LB: loop body
LE: loop exit
PB: predicated region body
PF: predicated region fallthrough
CT: control target
= control target key end

     0   :  { %s1357_s0 = inlined_call_operand.vmem [shape: f32[2,48], index: 0, kind: input, shape index: {}]   ;;  %s1358_s1 = inlined_call_operand.vmem [shape: f32[2,4], index: 1, kind: input, shape index: {}]   ;;  %s1359_s2 = inlined_call_operand.hbm [shape: bf16[4,8,8,128], index: 2, kind: input, shape index: {}]   ;;  %s1360_s3 = inlined_call_operand.hbm [shape: f32[2,8,128], index: 3, kind: output, shape index: {}]  }
   0x1   :  { %1375 = sst [smem:[#allocation21_spill]] %s1357_s0 }
   0x2   :  { %1376 = sst [smem:[#allocation22_spill]] %s1358_s1 }
   0x3   :  { %1377 = sst [smem:[#allocation23_spill]] %s1359_s2 }
   0x4   :  { %1378 = sst [smem:[#allocation24_spill]] %s1360_s3 }
   0x5   :  { %8 = vsyncpa [#allocation5], 0 }
   0x6   :  { %9 = vsyncpa [#allocation7], 0 }
   0x7   :  { %10 = vsyncpa [#allocation3], 0 }
   0x8   :  { %12 = vsyncpa [#allocation3 + $0x1], 0 }
   0x9   :  { %13 = vsyncpa [#allocation4], 0  ;;  %s971_s12 = smov 0   ;;  %s973_s13 = smov 0  }
   0xa   :  { %s975_s14 = smov 0   ;;  %s977_s15 = smov 0  }
   0xb   :  { %s979_s16 = smov 0   ;;  %s981_s17 = smov 0  }
   0xc LB: > { %1379 = sst [smem:[#allocation14_spill]] %s924_s13  ;;  %s1366_s18 = sadd.s32 4294967295, %s940_s17   ;;  %s940_s17 = sphi %s981_s17, %s19_s17   ;;  %s936_s16 = sphi %s979_s16, %s1411_s16   ;;  %s932_s15 = sphi %s977_s15, %s1410_s15   ;;  %s928_s14 = sphi %s975_s14, %s1409_s14   ;;  %s924_s13 = sphi %s973_s13, %s1408_s13   ;;  %s920_s12 = sphi %s971_s12, %s1407_s12  }
   0xd   : > { %1380 = sst [smem:[#allocation15_spill]] %s928_s14  ;;  %s91_s19 = sadd.s32 1, %s928_s14 }
   0xe   : > { %1381 = sst [smem:[#allocation16_spill]] %s932_s15  ;;  %p98_p0 = scmp.ne.s32.totalorder %s928_s14, %s924_s13 }
   0xf   : > { %1382 = sst [smem:[#allocation17_spill]] %s936_s16  ;;  %p99_p1 = scmp.eq.s32.totalorder %s940_s17, 0 }
  0x10   : > { %1383 = sst [smem:[#allocation18_spill]] %s940_s17  ;;  %p104_p2 = scmp.ne.s32.totalorder %s924_s13, %s920_s12 }
  0x11   : > { %p1007_p3 = scmp.eq.s32.totalorder %s1366_s18, 0  ;;  %p100_p4 = por %p99_p1, %p98_p0 }
  0x12   : > { %p618_p5 = scmp.ge.s32.totalorder %s940_s17, 1  ;;  %p143_p7 = scmp.lt.s32.totalorder %s940_s17, 5 }
  0x13   : > { %s1384_s20 = scalar_select %p1007_p3, 1, 0 }
  0x14   : > { %p1014_p6 = por %p1007_p3, %p104_p2  ;;  %s1386_s0 = sld [smem:[#allocation21_spill]] }
  0x15   : > { %p1022_p8 = pnand %p618_p5, %p143_p7  ;;  %p727_p10 = scmp.lt.s32.totalorder %s940_s17, 4 }
  0x16   : > { %s1385_s21 = scalar_select %p1014_p6, 1, 0 }
  0x17   : > { %s1387_s25 = scalar_select %p1022_p8, 1, 0 }
  0x18   : > { %p714_p9 = pneg %p1022_p8  ;;  %s1388_s1 = sld [smem:[#allocation22_spill]] }
  0x19   : > { %p1038_p12 = pnand %p727_p10, %p100_p4 }
  0x1a   : > { %s156_s24 = sshll.u32 %s1386_s0, 4  ;;  %p1034_p11 = pnand %p714_p9, %p1007_p3  ;;  %s157_s24 = int_to_ptr.vmem [resolvable:$true] %s156_s24 }
  0x1b   : > { %s1390_s30 = scalar_select %p1038_p12, 1, 0 }
  0x1c   : > { %s792_s4 = scalar_lea.vmem %s157_s24, 32  ;;  %p794_p0 = pneg %p1034_p11 }
  0x1d   : > { %p793_p13 = scmp.ne.s32.totalorder %s157_s24, %s792_s4  ;;  %p800_p5 = scmp.lt.s32.totalorder %s157_s24, %s157_s24 }
  0x1e   : > { %s167_s28 = sshll.u32 %s1388_s1, 4  ;;  %p801_p7 = scmp.lt.s32.totalorder %s792_s4, %s792_s4  ;;  %s168_s28 = int_to_ptr.vmem [resolvable:$true] %s167_s28 }
  0x1f   : > { %p795_p1 = pnand %p794_p0, %p793_p13 }
  0x20   : > { %p802_p6 = por %p801_p7, %p800_p5 }
  0x21   : > { %p796_p2 = pneg %p795_p1 }
  0x23   : > { %p803_p8 = pnand %p802_p6, %p796_p2 }
  0x25   : > { %806 = shalt.err (!%p803_p8)
}
  0x26   : > { %s942_s5 = smov [#allocation2]   ;;  %s807_s6 = scalar_lea.vmem %s168_s28, 32 }
  0x27   : > { %717 = dma.vmem_to_smem (!%p1034_p11), %s157_s24, 32, %s942_s5, [#allocation5]  }
  0x28   : > { %p808_p4 = scmp.ne.s32.totalorder %s168_s28, %s807_s6  ;;  %p815_p3 = scmp.lt.s32.totalorder %s168_s28, %s168_s28 }
  0x29   : > { %p816_p12 = scmp.lt.s32.totalorder %s807_s6, %s807_s6 }
  0x2a   : > { %p810_p9 = pnand %p808_p4, %p794_p0 }
  0x2b   : > { %p817_p13 = por %p816_p12, %p815_p3 }
  0x2c   : > { %p811_p10 = pneg %p810_p9 }
  0x2e   : > { %p818_p1 = pnand %p817_p13, %p811_p10 }
  0x30   : > { %821 = shalt.err (!%p818_p1)
}
  0x31   : > { %s943_s7 = smov [#allocation6]   ;;  %s178_s8 = sand.u32 1, %s928_s14  }
  0x32   : > { %720 = dma.vmem_to_smem (!%p1034_p11), %s168_s28, 32, %s943_s7, [#allocation7]  }
  0x33   : > { %s31_s9 = sadd.s32 1, %s936_s16  ;;  %s622_s10 = sshll.u32 %s178_s8, 5 }
  0x34   : > { %p32_p6 = scmp.ge.s32.totalorder %s31_s9, 4  ;;  %s654_s11 = sshll.u32 %s936_s16, 9 }
  0x35   : > { %s1392_s2 = sld [smem:[#allocation23_spill]]  ;;  %s182_s24 = scalar_lea.vmem [#allocation8], %s622_s10 }
  0x36   : > { %s1413_s9 = smov (%p32_p6, %s31_s9), 0  ;;  %s191_s26 = sshll.u32 %s182_s24, 4  ;;  %s1060_s26 = int_to_ptr.vmem [resolvable:$true] %s191_s26 }
  0x37   : > { %1391 = sst [smem:[#allocation19_spill]] %s1413_s9  ;;  %s84_s27 = ssub.s32 %s936_s16, %s1413_s9 }
  0x38   : > { %p89_p3 = scmp.eq.s32.totalorder %s84_s27, 0  ;;  %s1067_s29 = scalar_lea.sflag [#allocation3], %s178_s8 }
  0x39   : > { %p1394_p11 = scmp.ne.s32.totalorder %s1390_s30, 0 }
  0x3a   : > { %s1065_s28 = scalar_select %p89_p3, %s928_s14, %s91_s19  }
  0x3b   : > { %s1056_s23 = scalar_lea.hbm %s1392_s2, %s654_s11  ;;  %p824_p12 = pneg %p1394_p11 }
  0x3c   : > { %1393 = sst [smem:[#allocation20_spill]] %s1065_s28  ;;  %s822_s4 = scalar_lea.hbm %s1056_s23, 512 }
  0x3d   : > { %p823_p8 = scmp.ne.s32.totalorder %s1056_s23, %s822_s4  ;;  %s827_s7 = scalar_lea.hbm %s1392_s2, 2048 }
  0x3e   : > { %p828_p5 = scmp.lt.u32.totalorder %s1056_s23, %s1392_s2  ;;  %p829_p7 = scmp.lt.u32.totalorder %s827_s7, %s822_s4 }
  0x3f   : > { %p825_p0 = pnand %p824_p12, %p823_p8  ;;  %p831_p9 = scmp.lt.u32.totalorder %s822_s4, %s1056_s23 }
  0x40   : > { %p830_p4 = por %p829_p7, %p828_p5 }
  0x41   : > { %p826_p2 = pneg %p825_p0 }
  0x42   : > { %p832_p10 = por %p831_p9, %p830_p4 }
  0x44   : > { %p833_p13 = pnand %p832_p10, %p826_p2 }
  0x46   : > { %836 = shalt.err (!%p833_p13)
}
  0x47   : > { %s837_s19 = scalar_lea.vmem %s1060_s26, 512  ;;  %s944_s8 = smov [#allocation8]  }
  0x48   : > { %p838_p1 = scmp.ne.s32.totalorder %s1060_s26, %s837_s19  ;;  %s842_s12 = sshll.u32 %s944_s8, 4  ;;  %s843_s12 = int_to_ptr.vmem [resolvable:$false] %s842_s12 }
  0x49   : > { %s844_s22 = scalar_lea.vmem %s843_s12, 1024  ;;  %p845_p8 = scmp.lt.s32.totalorder %s1060_s26, %s843_s12 }
  0x4a   : > { %p840_p6 = pnand %p838_p1, %p824_p12  ;;  %p846_p0 = scmp.lt.s32.totalorder %s844_s22, %s837_s19 }
  0x4c   : > { %p841_p3 = pneg %p840_p6  ;;  %p847_p5 = por %p846_p0, %p845_p8 }
  0x4e   : > { %p848_p7 = pnand %p847_p5, %p841_p3 }
  0x50   : > { %851 = shalt.err (!%p848_p7)
}
  0x51   : > { %s945_s24 = smov 64   ;;  %s946_s27 = smov 4  }
  0x52   : > { %724 = dma.hbm_to_vmem [thread:$0]  (!%p1394_p11), %s1056_s23, 512, %s1060_s26, %s1067_s29, %s945_s24, %s945_s24, %s946_s27  }
  0x53   : > { %p1395_p12 = scmp.ne.s32.totalorder %s1387_s25, 0 }
  0x54   : > { %p1396_p2 = scmp.ne.s32.totalorder (!%p1395_p12), %s1384_s20, 0 }
  0x55   : > { %203 = sbr.rel (%p1395_p12) target bundleno = 213 (0xd5), region = 32 }
  0x5c   : > { %903 = dma.done.wait (%p1396_p2), [#allocation5], 32  }
  0x5d   : > { %905 = vsyncadd (%p1396_p2), [#allocation5], 4294967264 }
  0x5e   : > { %907 = dma.done.wait (%p1396_p2), [#allocation7], 32  }
  0x5f   : > { %909 = vsyncadd (%p1396_p2), [#allocation7], 4294967264  ;;  %s213_s4 = sand.u32 1, %s924_s13   ;;  %p1397_p11 = scmp.ne.s32.totalorder %s1385_s21, 0 }
  0x60   : > { %s628_s30 = sshll.u32 %s213_s4, 5  ;;  %s214_s23 = scalar_lea.sflag [#allocation3], %s213_s4 }
  0x61   : > { %s217_s26 = scalar_lea.vmem [#allocation8], %s628_s30 }
  0x62   : > { %911 = dma.done.wait (%p1397_p11), %s214_s23, 512  }
  0x63   : > { %913 = vsyncadd (%p1397_p11), %s214_s23, 4294966784 }
  0x64   : > { %222 = sfence }
  0x65   : > { %p629_p4 = scmp.ne.s32.totalorder %s932_s15, 0 }
  0x66   : > { %v947_v0 = vmov (!%p629_p4), 0.0  }
  0x67   : > { %239 = sbr.rel (%p629_p4) target bundleno = 110 (0x6e), region = 48  ;;  %240 = vst [vmem:[#allocation9] sm:$0xff] (!%p629_p4), %v947_v0  ;;  %241 = vst [vmem:[#allocation9 + $0x8] sm:$0xff] (!%p629_p4), %v947_v0 }
  0x6e PF: > { %s1112_s20 = smul.u32 12, %s932_s15  ;;  %v682_v1 = vld [vmem:[%s217_s26] sm:$0xff]   ;;  %v698_v2 = vld [vmem:[%s217_s26 + $0x10] sm:$0xff]   ;;  %v697_v5 = vld [vmem:[%s217_s26 + $0x8] sm:$0xff]   ;;  %s1214_s2 = sld [smem:[#allocation6 + %s932_s15]] }
  0x6f   : > { %v1123_v3 = vunpack.c.l.bf16 %v682_v1  ;;  %v1125_v4 = vunpack.c.h.bf16 %v682_v1  ;;  %v691_v6 = vunpack.c.l.bf16 %v698_v2  ;;  %v692_v7 = vunpack.c.h.bf16 %v698_v2  ;;  %v699_v8 = vld [vmem:[%s217_s26 + $0x18] sm:$0xff]  }
  0x70   : > { %s1115_s25 = sld [smem:[#allocation2 + %s1112_s20]]  ;;  %s1118_s21 = sadd.s32 1, %s1112_s20  ;;  %v1142_v9 = vunpack.c.l.bf16 %v697_v5  ;;  %v1144_v10 = vunpack.c.h.bf16 %v697_v5  ;;  %v695_v11 = vunpack.c.l.bf16 %v699_v8  ;;  %v696_v12 = vunpack.c.h.bf16 %v699_v8 }
  0x71   : > { %s1121_s29 = sld [smem:[#allocation2 + %s1118_s21]]  ;;  %s1128_s5 = sadd.s32 8, %s1112_s20  ;;  %v1153_v13 = vsub.f32 %v691_v6, %v1123_v3  ;;  %v1156_v14 = vsub.f32 %v692_v7, %v1125_v4 }
  0x72   : > { %s1131_s6 = sld [smem:[#allocation2 + %s1128_s5]]  ;;  %s1134_s7 = sadd.s32 2, %s1112_s20  ;;  %v1178_v16 = vsub.f32 %v695_v11, %v1142_v9  ;;  %v1181_v17 = vsub.f32 %v696_v12, %v1144_v10 }
  0x73   : > { %s1137_s10 = sld [smem:[#allocation2 + %s1134_s7]]  ;;  %s1140_s11 = sadd.s32 3, %s1112_s20 }
  0x74   : > { %s1147_s19 = sadd.s32 9, %s1112_s20  ;;  %s1150_s8 = sld [smem:[#allocation2 + %s1140_s11]]  ;;  %v452_v12 = vstv %s1214_s2 }
  0x75   : > { %s1159_s12 = sld [smem:[#allocation2 + %s1147_s19]]  ;;  %s1162_s22 = sadd.s32 6, %s1112_s20 }
  0x76   : > { %v398_v15 = vstv %s1115_s25  ;;  %s1166_s24 = sld [smem:[#allocation2 + %s1162_s22]]  ;;  %s1169_s27 = sadd.s32 10, %s1112_s20 }
  0x77   : > { %s1172_s4 = sld [smem:[#allocation2 + %s1169_s27]]  ;;  %s1175_s30 = sadd.s32 11, %s1112_s20  ;;  %v401_v18 = vstv %s1121_s29  ;;  %v399_v19 = vmul.f32 %v398_v15, %v1153_v13  ;;  %v404_v20 = vmul.f32 %v398_v15, %v1156_v14 }
  0x78   : > { %s1185_s23 = sld [smem:[#allocation2 + %s1175_s30]]  ;;  %s267_s26 = sshra.s32 %s1112_s20, 7  ;;  %v402_v22 = vmul.f32 %v401_v18, %v1156_v14  ;;  %v406_v23 = vmul.f32 %v401_v18, %v1153_v13  ;;  %v408_v39 = vstv %s1131_s6 }
  0x79   : > { %s1191_s25 = sadd.s32 7, %s1112_s20  ;;  %s655_s18 = sshll.u32 %s267_s26, 7  ;;  %v420_v21 = vstv %s1137_s10  ;;  %v400_v27 = vadd.f32 %v1123_v3, %v399_v19  ;;  %v405_v28 = vadd.f32 %v1125_v4, %v404_v20  ;;  %v451_v20 = vld [vmem:[#allocation9] sm:$0xff] }
  0x7a   : > { %s1195_s0 = sld [smem:[#allocation2 + %s1191_s25]]  ;;  %s275_s1 = sshra.s32 %s1118_s21, 7  ;;  %v421_v24 = vmul.f32 %v420_v21, %v1178_v16  ;;  %v423_v25 = vstv %s1150_s8  ;;  %v426_v26 = vmul.f32 %v420_v21, %v1181_v17 }
  0x7b   : > { %s1199_s29 = sshll.u32 %s275_s1, 7  ;;  %s656_s10 = sadd.s32 128, %s655_s18  ;;  %v424_v29 = vmul.f32 %v423_v25, %v1181_v17  ;;  %v428_v30 = vmul.f32 %v423_v25, %v1178_v16  ;;  %v403_v37 = vsub.f32 %v400_v27, %v402_v22  ;;  %v407_v38 = vadd.f32 %v406_v23, %v405_v28 }
  0x7c   : > { %s272_s26 = sand.u32 127, %s1112_s20  ;;  %s1211_s1 = sadd.s32 4, %s1112_s20  ;;  %v422_v31 = vadd.f32 %v1142_v9, %v421_v24  ;;  %v427_v32 = vadd.f32 %v1144_v10, %v426_v26  ;;  %v410_v40 = vstv %s1159_s12  ;;  %v435_v45 = vstv %s1166_s24 }
  0x7d   : > { %s658_s18 = sadd.s32 128, %s1199_s29  ;;  %s280_s8 = sand.u32 127, %s1118_s21  ;;  %v430_v33 = vstv %s1172_s4  ;;  %v409_v49 = vmul.f32 %v408_v39, %v403_v37  ;;  %v411_v50 = vmul.f32 %v410_v40, %v407_v38  ;;  %v415_v51 = vmul.f32 %v410_v40, %v403_v37 }
  0x7e   : > { %v432_v34 = vstv %s1185_s23  ;;  %s1223_s9 = sadd.s32 5, %s1112_s20  ;;  %s273_s16 = sadd.s32 %s656_s10, %s272_s26  ;;  %v425_v35 = vsub.f32 %v422_v31, %v424_v29  ;;  %v429_v36 = vadd.f32 %v428_v30, %v427_v32  ;;  %v416_v52 = vmul.f32 %v408_v39, %v407_v38 }
  0x7f   : > { %s1226_s28 = sld [smem:[#allocation2 + %s1211_s1]]  ;;  %s283_s14 = sshra.s32 %s1211_s1, 7  ;;  %v412_v57 = vsub.f32 %v409_v49, %v411_v50 }
  0x80   : > { %s1232_s21 = sld [smem:[#allocation2 + %s1223_s9]]  ;;  %s281_s4 = sadd.s32 %s658_s18, %s280_s8  ;;  %v431_v41 = vmul.f32 %v430_v33, %v425_v35  ;;  %v433_v42 = vmul.f32 %v432_v34, %v429_v36  ;;  %v437_v43 = vmul.f32 %v432_v34, %v425_v35  ;;  %v438_v44 = vmul.f32 %v430_v33, %v429_v36 }
  0x81   : > { %s1234_s20 = sld [smem:[#allocation2 + %s273_s16]]  ;;  %s291_s23 = sshra.s32 %s1223_s9, 7  ;;  %v440_v46 = vstv %s1195_s0  ;;  %v417_v58 = vadd.f32 %v416_v52, %v415_v51 }
  0x82   : > { %s1239_s29 = sshll.u32 %s283_s14, 7  ;;  %s299_s10 = sshra.s32 %s1128_s5, 7  ;;  %v434_v47 = vsub.f32 %v431_v41, %v433_v42  ;;  %v439_v48 = vadd.f32 %v438_v44, %v437_v43 }
  0x83   : > { %s1242_s6 = sld [smem:[#allocation2 + %s281_s4]]  ;;  %s663_s12 = sshll.u32 %s299_s10, 7 }
  0x84   : > { %s1244_s16 = sshll.u32 %s291_s23, 7  ;;  %s664_s0 = sadd.s32 128, %s663_s12  ;;  %v436_v53 = vadd.f32 %v435_v45, %v434_v47  ;;  %v441_v54 = vadd.f32 %v440_v46, %v439_v48 }
  0x85   : > { %s304_s14 = sand.u32 127, %s1128_s5  ;;  %s307_s24 = sshra.s32 %s1147_s19, 7  ;;  %v413_v59 = vstv %s1226_s28 }
  0x86   : > { %s305_s18 = sadd.s32 %s664_s0, %s304_s14  ;;  %v442_v55 = vmul.f32 %v436_v53, %v436_v53  ;;  %v443_v56 = vmul.f32 %v441_v54, %v441_v54  ;;  %s1250_s4 = sshll.u32 %s307_s24, 7  ;;  %v418_v60 = vstv %s1232_s21  ;;  %v414_v63 = vadd.f32 %v413_v59, %v412_v57 }
  0x87   : > { %s315_s10 = sshra.s32 %s1134_s7, 7  ;;  %s1256_s5 = sld [smem:[#allocation2 + %s305_s18]]  ;;  %v419_v0 = vadd.f32 %v418_v60, %v417_v58  ;;  %v456_v19 = vstv %s1234_s20 }
  0x88   : > { %v444_v61 = vadd.f32 %v443_v56, %v442_v55  ;;  %s667_s12 = sshll.u32 %s315_s10, 7  ;;  %s666_s0 = sadd.s32 128, %s1250_s4  ;;  %v447_v1 = vmul.f32 %v436_v53, %v414_v63  ;;  %v457_v26 = vmul.f32 %v456_v19, %v1153_v13  ;;  %v462_v27 = vmul.f32 %v456_v19, %v1156_v14 }
  0x89   : > { %s668_s14 = sadd.s32 128, %s667_s12  ;;  %s320_s26 = sand.u32 127, %s1134_s7  ;;  %v448_v2 = vmul.f32 %v441_v54, %v419_v0  ;;  %v459_v28 = vstv %s1242_s6  ;;  %v510_v0 = vld [vmem:[#allocation9 + $0x8] sm:$0xff] }
  0x8a   : > { %v445_v62 = vmax.f32 %v444_v61, 1e-12  ;;  %s323_s24 = sshra.s32 %s1140_s11, 7  ;;  %s321_s23 = sadd.s32 %s668_s14, %s320_s26  ;;  %v460_v29 = vmul.f32 %v459_v28, %v1156_v14  ;;  %v463_v30 = vadd.f32 %v1125_v4, %v462_v27  ;;  %v464_v31 = vmul.f32 %v459_v28, %v1153_v13 }
  0x8b   : > { %s669_s8 = sshll.u32 %s323_s24, 7  ;;  %s322_s28 = sld [smem:[#allocation2 + %s321_s23]]  ;;  %v449_v5 = vadd.f32 %v448_v2, %v447_v1 }
  0x8c   : > { %788 = vrsqrt.f32 %v445_v62  ;;  %s670_s21 = sadd.s32 128, %s669_s8  ;;  %s328_s13 = sand.u32 127, %s1140_s11  ;;  %v465_v36 = vadd.f32 %v464_v31, %v463_v30 }
  0x8d   : > { %s331_s18 = sshra.s32 %s1162_s22, 7  ;;  %s329_s10 = sadd.s32 %s670_s21, %s328_s13  ;;  %v466_v4 = vstv %s1256_s5 }
  0x8e   : > { %s671_s4 = sshll.u32 %s331_s18, 7  ;;  %s312_s12 = sand.u32 127, %s1147_s19  ;;  %v474_v45 = vmul.f32 %v466_v4, %v465_v36 }
  0x8f   : > { %s1264_s7 = sld [smem:[#allocation2 + %s329_s10]]  ;;  %s672_s3 = sadd.s32 128, %s671_s4 }
  0x90   : > { %s339_s17 = sshra.s32 %s1191_s25, 7  ;;  %s336_s15 = sand.u32 127, %s1162_s22 }
  0x91   : > { %s673_s26 = sshll.u32 %s339_s17, 7  ;;  %s313_s23 = sadd.s32 %s666_s0, %s312_s12  ;;  %v478_v6 = vstv %s322_s28 }
  0x92   : > { %s674_s11 = sadd.s32 128, %s673_s26  ;;  %s344_s13 = sand.u32 127, %s1191_s25  ;;  %v479_v7 = vmul.f32 %v478_v6, %v1178_v16  ;;  %v484_v8 = vmul.f32 %v478_v6, %v1181_v17 }
  0x93   : > { %s347_s8 = sshra.s32 %s1169_s27, 7  ;;  %s337_s19 = sadd.s32 %s672_s3, %s336_s15 }
  0x94   : > { %s675_s14 = sshll.u32 %s347_s8, 7  ;;  %s345_s24 = sadd.s32 %s674_s11, %s344_s13  ;;  %v480_v21 = vadd.f32 %v1142_v9, %v479_v7  ;;  %v485_v24 = vadd.f32 %v1144_v10, %v484_v8 }
  0x95   : > { %s676_s22 = sadd.s32 128, %s675_s14  ;;  %v481_v15 = vstv %s1264_s7  ;;  %s352_s17 = sand.u32 127, %s1169_s27 }
  0x96   : > { %v789_v11 = vpop.eup %788  ;;  %s355_s0 = sshra.s32 %s1175_s30, 7  ;;  %s353_s21 = sadd.s32 %s676_s22, %s352_s17  ;;  %v482_v23 = vmul.f32 %v481_v15, %v1181_v17  ;;  %v486_v25 = vmul.f32 %v481_v15, %v1178_v16  ;;  %v458_v17 = vadd.f32 %v1123_v3, %v457_v26 }
  0x97   : > { %v450_v18 = vmul.f32 %v789_v11, %v449_v5  ;;  %s677_s28 = sshll.u32 %s355_s0, 7  ;;  %s354_s3 = sld [smem:[#allocation2 + %s353_s21]] }
  0x98   : > { %s678_s15 = sadd.s32 128, %s677_s28  ;;  %s1281_s2 = sld [smem:[#allocation2 + %s313_s23]]  ;;  %v483_v10 = vsub.f32 %v480_v21, %v482_v23  ;;  %v487_v16 = vadd.f32 %v486_v25, %v485_v24  ;;  %v461_v35 = vsub.f32 %v458_v17, %v460_v29 }
  0x99   : > { %v453_v22 = vmul.f32 %v452_v12, %v450_v18  ;;  %s360_s27 = sand.u32 127, %s1175_s30  ;;  %s1286_s25 = sld [smem:[#allocation2 + %s337_s19]] }
  0x9a   : > { %s361_s20 = sadd.s32 %s678_s15, %s360_s27  ;;  %s1289_s18 = sld [smem:[#allocation2 + %s345_s24]]  ;;  %v467_v42 = vmul.f32 %v466_v4, %v461_v35 }
  0x9b   : > { %v454_v9 = vadd.f32 %v453_v22, %v451_v20  ;;  %s362_s10 = sld [smem:[#allocation2 + %s361_s20]]  ;;  %s296_s4 = sand.u32 127, %s1223_s9 }
  0x9c   : > { %s1398_s30 = sand.u32 127, %s1211_s1  ;;  %s1399_s6 = sadd.s32 128, %s1239_s29 }
  0x9d   : > { %455 = vst [vmem:[#allocation9] sm:$0xff] %v454_v9  ;;  %v488_v32 = vstv %s354_s3  ;;  %s1400_s12 = sld [smem:[#allocation16_spill]]  ;;  %s289_s9 = sadd.s32 %s1399_s6, %s1398_s30 }
  0x9e   : > { %s1401_s7 = sadd.s32 128, %s1244_s16  ;;  %v489_v33 = vmul.f32 %v488_v32, %v483_v10  ;;  %v496_v34 = vmul.f32 %v488_v32, %v487_v16  ;;  %s1302_s23 = sld [smem:[#allocation2 + %s289_s9]]  ;;  %v468_v14 = vstv %s1281_s2 }
  0x9f   : > { %s297_s26 = sadd.s32 %s1401_s7, %s296_s4  ;;  %v493_v38 = vstv %s1286_s25  ;;  %v469_v43 = vmul.f32 %v468_v14, %v465_v36  ;;  %v473_v44 = vmul.f32 %v468_v14, %v461_v35  ;;  %s1402_s13 = sld [smem:[#allocation18_spill]] }
  0xa0   : > { %s298_s11 = sld [smem:[#allocation2 + %s297_s26]]  ;;  %v498_v39 = vstv %s1289_s18  ;;  %s948_s14 = smov [#allocation9]  }
  0xa1   : > { %v490_v3 = vstv %s362_s10  ;;  %v470_v50 = vsub.f32 %v467_v42, %v469_v43  ;;  %v475_v51 = vadd.f32 %v474_v45, %v473_v44  ;;  %s524_s24 = sshll.u32 %s948_s14, 4  ;;  %s525_s24 = int_to_ptr.vmem [resolvable:$true] %s524_s24 }
  0xa2   : > { %v491_v37 = vmul.f32 %v490_v3, %v487_v16  ;;  %v495_v13 = vmul.f32 %v490_v3, %v483_v10  ;;  %s852_s0 = scalar_lea.vmem %s525_s24, 256  ;;  %p859_p6 = scmp.lt.s32.totalorder %s525_s24, %s525_s24 }
  0xa3   : > { %s363_s1 = sshra.s32 %s1400_s12, 7  ;;  %s368_s5 = sand.u32 127, %s1400_s12 }
  0xa4   : > { %v492_v40 = vsub.f32 %v489_v33, %v491_v37  ;;  %v497_v41 = vadd.f32 %v496_v34, %v495_v13  ;;  %s679_s29 = sshll.u32 %s363_s1, 7  ;;  %v471_v52 = vstv %s1302_s23  ;;  %p853_p10 = scmp.ne.s32.totalorder %s525_s24, %s852_s0 }
  0xa5   : > { %s680_s16 = sadd.s32 128, %s679_s29  ;;  %v472_v56 = vadd.f32 %v471_v52, %v470_v50  ;;  %s1403_s22 = sadd.s32 4294967295, %s1402_s13  }
  0xa6   : > { %v494_v46 = vadd.f32 %v493_v38, %v492_v40  ;;  %v499_v47 = vadd.f32 %v498_v39, %v497_v41  ;;  %v476_v53 = vstv %s298_s11  ;;  %s369_s8 = sadd.s32 %s680_s16, %s368_s5  ;;  %p1313_p9 = scmp.eq.s32.totalorder %s1403_s22, 3 }
  0xa7   : > { %v477_v57 = vadd.f32 %v476_v53, %v475_v51  ;;  %s370_s19 = sld [smem:[#allocation6 + %s369_s8]]  ;;  %p860_p3 = scmp.lt.s32.totalorder %s852_s0, %s852_s0 }
  0xa8   : > { %v500_v48 = vmul.f32 %v494_v46, %v494_v46  ;;  %v501_v49 = vmul.f32 %v499_v47, %v499_v47  ;;  %v505_v58 = vmul.f32 %v494_v46, %v472_v56  ;;  %p854_p13 = pnand %p853_p10, %p1313_p9 }
  0xa9   : > { %v506_v59 = vmul.f32 %v499_v47, %v477_v57  ;;  %p861_p8 = por %p860_p3, %p859_p6 }
  0xaa   : > { %v502_v54 = vadd.f32 %v501_v49, %v500_v48  ;;  %p855_p1 = pneg %p854_p13 }
  0xab   : > { %v507_v60 = vadd.f32 %v506_v59, %v505_v58 }
  0xac   : > { %v503_v55 = vmax.f32 %v502_v54, 1e-12  ;;  %p862_p0 = pnand %p861_p8, %p855_p1 }
  0xad   : > { %v511_v62 = vstv %s370_s19 }
  0xae   : > { %790 = vrsqrt.f32 %v503_v55 }
  0xb8   : > { %v791_v61 = vpop.eup %790 }
  0xb9   : > { %v508_v63 = vmul.f32 %v791_v61, %v507_v60 }
  0xbb   : > { %v512_v1 = vmul.f32 %v511_v62, %v508_v63 }
  0xbd   : > { %v513_v2 = vadd.f32 %v512_v1, %v510_v0 }
  0xbf   : > { %514 = vst [vmem:[#allocation9 + $0x8] sm:$0xff] %v513_v2 }
  0xc0   : > { %865 = shalt.err (!%p862_p0)
}
  0xc1   : > { %s1405_s3 = sld [smem:[#allocation24_spill]] }
  0xc7   : > { %s866_s15 = scalar_lea.hbm %s1405_s3, 256 }
  0xc8   : > { %p867_p5 = scmp.ne.s32.totalorder %s1405_s3, %s866_s15  ;;  %p872_p2 = scmp.lt.u32.totalorder %s866_s15, %s1405_s3 }
  0xca   : > { %p868_p7 = pnand %p867_p5, %p1313_p9 }
  0xcc   : > { %p869_p12 = pneg %p868_p7 }
  0xce   : > { %p874_p11 = pnand %p872_p2, %p869_p12 }
  0xd0   : > { %877 = shalt.err (!%p874_p11)
}
  0xd1   : > { %s949_s18 = smov 128   ;;  %s950_s10 = smov 8  }
  0xd2   : > { %711 = dma.vmem_to_hbm [thread:$0]  (%p1313_p9), %s525_s24, 256, %s1405_s3, [#allocation4], %s949_s18, %s949_s18, %s950_s10  }
  0xd3   : > { %915 = dma.done.wait (%p1313_p9), [#allocation4], 256  }
  0xd4   : > { %917 = vsyncadd (%p1313_p9), [#allocation4], 4294967040 }
  0xd5 PF: > { %s1406_s6 = sld [smem:[#allocation18_spill]]  ;;  %s1407_s12 = sld [smem:[#allocation14_spill]] }
  0xd6   : > { %s1408_s13 = sld [smem:[#allocation15_spill]]  ;;  %s1409_s14 = sld [smem:[#allocation20_spill]] }
  0xd7   : > { %s1410_s15 = sld [smem:[#allocation17_spill]]  ;;  %s1411_s16 = sld [smem:[#allocation19_spill]] }
  0xdb   : > { %s19_s17 = sadd.s32 1, %s1406_s6  }
  0xdc   : > { %p16_p4 = scmp.ge.s32.totalorder %s19_s17, 6  }
  0xde   :  { %18 = sbr.rel (!%p16_p4) target bundleno = 12 (0xc), region = 91 }
  0xe5   :  { %540 = vsyncpa [#allocation3], 1 }
  0xe6   :  { %542 = vsyncpa [#allocation3 + $0x1], 1 }
  0xe7   :  { %543 = vsyncpa [#allocation4], 1 }
  0xe8   :  { %545 = vsyncpa [#allocation4 + $0x1], 1 }
  0xe9   :  { %546 = vsyncpa [#allocation5], 1 }
  0xea   :  { %548 = vsyncpa [#allocation5 + $0x1], 1 }
  0xeb   :  { %549 = vsyncpa [#allocation7], 1 }

</bundles_post_ra>
